<compile_context>
chip_gen: v7x
topology: tpu7x:2x2x1
jax: 0.10.0
libtpu: 0.0.40
codegen_flags: <defaults>
</compile_context>

<pallas_src>
import jax
import jax.numpy as jnp
from jax import lax
from jax.experimental import pallas as pl
from jax.experimental.pallas import tpu as pltpu

TK_IMG = 256   # K-tile for the 2048-wide image projection (2048 = 8 * 256)
TM_MAX = 512   # max image-batch (M) tile of the logits output


def _round_up(x, m):
    return ((x + m - 1) // m) * m


def _vmem_limit_bytes():
    # Generation-aware scoped-VMEM limit: ~75% of physical, clamped to
    # [32 MiB, 96 MiB] (v7x: 64 MiB physical -> 48 MiB; v5e/v6e: 128 -> 96).
    cap = 128 * 1024 * 1024
    try:
        cap = int(pltpu.get_tpu_info().vmem_capacity_bytes)
    except Exception:
        pass
    return int(min(max(cap * 3 // 4, 32 * 1024 * 1024), 96 * 1024 * 1024))


def clip_head_kernel(temp_ref,                    # SMEM (1,) f32 (scalar prefetch)
                     img_ref, wi_ref, bi_ref,     # (TM,TK) bf16, (TK,512) bf16, (1,512) f32
                     txt_ref, wt_ref, bt_ref,     # (N,768) bf16, (768,512) bf16, (1,512) f32
                     out_ref,                     # (TM,N) f32
                     acc_ref,                     # VMEM (TM,512) f32
                     temb_ref):                   # VMEM (N,512) bf16
    k = pl.program_id(1)

    @pl.when(k == 0)
    def _():
        # Init the image-projection accumulator with the broadcast bias
        # (replaces the zero fill; removes the bias add from finalize).
        acc_ref[...] = jnp.broadcast_to(bi_ref[...], acc_ref.shape)

        # Text projection + normalization, hoisted out of the finalize step so
        # it overlaps with the remaining w_img tile DMAs.
        t = jnp.dot(txt_ref[...], wt_ref[...],
                    preferred_element_type=jnp.float32) + bt_ref[...]
        # F.normalize(x, dim=1) == x * rsqrt(max(sum(x^2), eps^2)), eps=1e-12.
        t_inv = lax.rsqrt(jnp.maximum(
            jnp.sum(t * t, axis=-1, keepdims=True), 1e-24))
        temb_ref[...] = (t * t_inv).astype(temb_ref.dtype)

    # Image projection partial product: bf16 operands, f32 MXU accumulation.
    acc_ref[...] += jnp.dot(img_ref[...], wi_ref[...],
                            preferred_element_type=jnp.float32)

    @pl.when(k == pl.num_programs(1) - 1)
    def _():
        img_emb = acc_ref[...]
        img_inv = lax.rsqrt(jnp.maximum(
            jnp.sum(img_emb * img_emb, axis=-1, keepdims=True), 1e-24))
        # Fold temperature into the image-side scale (saves a (TM,N) multiply)
        # and cast to bf16 so the logits matmul runs native bf16 MXU passes.
        img_bf16 = (img_emb * (img_inv * temp_ref[0])).astype(jnp.bfloat16)

        # logits tile = image_emb @ text_emb.T  (contract the 512-dim embedding).
        out_ref[...] = lax.dot_general(
            img_bf16, temb_ref[...],
            dimension_numbers=(((1,), (1,)), ((), ())),
            preferred_element_type=jnp.float32)


def clip_head(image_features, text_features, w_img, b_img, w_txt, b_txt,
              temperature):
    """image_features: (B, 2048) f32; text_features: (B, 768) f32.
    Linear weights stored as (in_features, out_features) so the kernel does
    x @ W. Returns (B, B) f32 logits, matching SimpleCLIP.forward."""
    B_img, D_IMG = image_features.shape
    B_txt, D_TXT = text_features.shape
    D_EMB = w_img.shape[1]
    assert D_IMG % TK_IMG == 0

    # bf16 streaming for the large operands; f32 accumulation in-kernel.
    img = image_features.astype(jnp.bfloat16)
    txt = text_features.astype(jnp.bfloat16)
    wi = w_img.astype(jnp.bfloat16)
    wt = w_txt.astype(jnp.bfloat16)

    # M (image batch): pad to 16 sublanes (bf16 packing); tile when large.
    if B_img <= TM_MAX:
        tm = _round_up(B_img, 16)
        m_pad = tm
    else:
        tm = TM_MAX
        m_pad = _round_up(B_img, tm)
    # N (text batch) is the lane axis of the logits: pad to a multiple of 128
    # so the output writeback uses unmasked full-lane stores.
    n_pad = _round_up(B_txt, 128)

    if m_pad != B_img:
        img = jnp.pad(img, ((0, m_pad - B_img), (0, 0)))
    if n_pad != B_txt:
        txt = jnp.pad(txt, ((0, n_pad - B_txt), (0, 0)))

    n_m = m_pad // tm
    n_k = D_IMG // TK_IMG
    single = pl.Buffered(1)   # constant-index blocks: no double-buffer copy

    grid_spec = pltpu.PrefetchScalarGridSpec(
        num_scalar_prefetch=1,          # temperature -> SMEM
        grid=(n_m, n_k),
        in_specs=[
            pl.BlockSpec((tm, TK_IMG), lambda i, k, temp: (i, k)),     # img feats
            pl.BlockSpec((TK_IMG, D_EMB), lambda i, k, temp: (k, 0)),  # w_img tile
            pl.BlockSpec((1, D_EMB), lambda i, k, temp: (0, 0),
                         pipeline_mode=single),                        # b_img
            pl.BlockSpec((n_pad, D_TXT), lambda i, k, temp: (0, 0),
                         pipeline_mode=single),                        # txt feats
            pl.BlockSpec((D_TXT, D_EMB), lambda i, k, temp: (0, 0),
                         pipeline_mode=single),                        # w_txt
            pl.BlockSpec((1, D_EMB), lambda i, k, temp: (0, 0),
                         pipeline_mode=single),                        # b_txt
        ],
        out_specs=pl.BlockSpec((tm, n_pad), lambda i, k, temp: (i, 0)),
        scratch_shapes=[
            pltpu.VMEM((tm, D_EMB), jnp.float32),       # image-proj accumulator
            pltpu.VMEM((n_pad, D_EMB), jnp.bfloat16),   # normalized text emb
        ],
    )

    out = pl.pallas_call(
        clip_head_kernel,
        out_shape=jax.ShapeDtypeStruct((m_pad, n_pad), jnp.float32),
        grid_spec=grid_spec,
        compiler_params=pltpu.CompilerParams(
            dimension_semantics=("parallel", "arbitrary"),  # M parallel, K reduction
            vmem_limit_bytes=_vmem_limit_bytes()),
    )(temperature, img, wi, b_img, txt, wt, b_txt)

    return out[:B_img, :B_txt]


def reference_head(image_features, text_features, w_img, b_img, w_txt, b_txt,
                   temperature):
    hp = lax.Precision.HIGHEST
    img_emb = jnp.dot(image_features, w_img, precision=hp) + b_img
    txt_emb = jnp.dot(text_features, w_txt, precision=hp) + b_txt
    img_emb = img_emb / jnp.maximum(
        jnp.linalg.norm(img_emb, axis=1, keepdims=True), 1e-12)
    txt_emb = txt_emb / jnp.maximum(
        jnp.linalg.norm(txt_emb, axis=1, keepdims=True), 1e-12)
    return jnp.dot(img_emb, txt_emb.T, precision=hp) * temperature[0]


if __name__ == "__main__":
    # Small batch; feature widths fixed by the module (resnet50 2048, GPT2 768).
    B, D_IMG, D_TXT, D_EMB = 8, 2048, 768, 512

    key = jax.random.PRNGKey(0)
    k_img, k_txt, k_wi, k_bi, k_wt, k_bt = jax.random.split(key, 6)

    # Stand-ins for resnet50(image).view(B,-1) and GPT2 last_hidden_state[:,-1,:]
    image_features = jax.random.normal(k_img, (B, D_IMG), jnp.float32)
    text_features = jax.random.normal(k_txt, (B, D_TXT), jnp.float32)

    # Deterministic synthetic parameters (nn.Linear weights transposed to (in,out)).
    w_img = jax.random.normal(k_wi, (D_IMG, D_EMB), jnp.float32) * 0.02
    b_img = jax.random.normal(k_bi, (1, D_EMB), jnp.float32) * 0.02
    w_txt = jax.random.normal(k_wt, (D_TXT, D_EMB), jnp.float32) * 0.02
    b_txt = jax.random.normal(k_bt, (1, D_EMB), jnp.float32) * 0.02
    temperature = jnp.ones((1,), jnp.float32) * 0.07  # nn.Parameter(ones([]) * 0.07)

    logits = clip_head(image_features, text_features, w_img, b_img, w_txt,
                       b_txt, temperature)
    logits = jax.block_until_ready(logits)

    # Reference on the same bf16-quantized operands (f32 HIGHEST matmuls), so
    # the comparison isolates kernel correctness from the deliberate bf16
    # streaming / bf16 logits-matmul operands.
    ref = reference_head(
        image_features.astype(jnp.bfloat16).astype(jnp.float32),
        text_features.astype(jnp.bfloat16).astype(jnp.float32),
        w_img.astype(jnp.bfloat16).astype(jnp.float32), b_img,
        w_txt.astype(jnp.bfloat16).astype(jnp.float32), b_txt, temperature)

    assert logits.shape == (B, B)
    max_err = float(jnp.max(jnp.abs(logits - ref)))
    assert jnp.allclose(logits, ref, atol=1e-3, rtol=1e-3), max_err
    print("KERNEL_OK")
</pallas_src>

<mosaic_0001>
module attributes {stable_mosaic.version = 11 : i64} {
  func.func @clip_head_kernel(%arg0: i32, %arg1: i32, %arg2: memref<1xf32, #tpu.memory_space<smem>>, %arg3: memref<16x256xbf16, #tpu.memory_space<vmem>>, %arg4: memref<256x512xbf16, #tpu.memory_space<vmem>>, %arg5: memref<1x512xf32, #tpu.memory_space<vmem>>, %arg6: memref<128x768xbf16, #tpu.memory_space<vmem>>, %arg7: memref<768x512xbf16, #tpu.memory_space<vmem>>, %arg8: memref<1x512xf32, #tpu.memory_space<vmem>>, %arg9: memref<16x128xf32, #tpu.memory_space<vmem>>, %arg10: memref<16x512xf32, #tpu.memory_space<vmem>>, %arg11: memref<128x512xbf16, #tpu.memory_space<vmem>>) attributes {dimension_semantics = [#tpu.dimension_semantics<parallel>, #tpu.dimension_semantics<arbitrary>], iteration_bounds = array<i64: 1, 8>, scalar_prefetch = 1 : i64, scratch_operands = 2 : i64, tpu.core_type = #tpu.core_type<tc>, window_params = [{transform_indices = @transform_0, window_bounds = array<i64: 16, 256>}, {transform_indices = @transform_1, window_bounds = array<i64: 256, 512>}, {pipeline_mode = #tpu.pipeline_mode<synchronous>, transform_indices = @transform_2, window_bounds = array<i64: 1, 512>}, {pipeline_mode = #tpu.pipeline_mode<synchronous>, transform_indices = @transform_3, window_bounds = array<i64: 128, 768>}, {pipeline_mode = #tpu.pipeline_mode<synchronous>, transform_indices = @transform_4, window_bounds = array<i64: 768, 512>}, {pipeline_mode = #tpu.pipeline_mode<synchronous>, transform_indices = @transform_5, window_bounds = array<i64: 1, 512>}, {transform_indices = @transform_6, window_bounds = array<i64: 16, 128>}]} {
    %c0_i32 = arith.constant 0 : i32
    %0 = arith.cmpi eq, %arg1, %c0_i32 : i32
    %1 = arith.extui %0 : i1 to i32
    %c0_i32_0 = arith.constant 0 : i32
    %2 = arith.cmpi ne, %1, %c0_i32_0 : i32
    scf.if %2 {
      %c0_9 = arith.constant 0 : index
      %c0_10 = arith.constant 0 : index
      %12 = vector.load %arg5[%c0_9, %c0_10] : memref<1x512xf32, #tpu.memory_space<vmem>>, vector<1x512xf32>
      %13 = vector.shape_cast %12 : vector<1x512xf32> to vector<1x512xf32>
      %14 = vector.broadcast %13 : vector<1x512xf32> to vector<16x512xf32>
      %c0_11 = arith.constant 0 : index
      %c0_12 = arith.constant 0 : index
      %15 = vector.load %arg10[%c0_11, %c0_12] : memref<16x512xf32, #tpu.memory_space<vmem>>, vector<16x512xf32>
      tpu.vector_store %arg10[%c0_11, %c0_12], %14 {strides = array<i32>} : memref<16x512xf32, #tpu.memory_space<vmem>>, vector<16x512xf32>,
      %c0_13 = arith.constant 0 : index
      %c0_14 = arith.constant 0 : index
      %16 = vector.load %arg6[%c0_13, %c0_14] : memref<128x768xbf16, #tpu.memory_space<vmem>>, vector<128x768xbf16>
      %c0_15 = arith.constant 0 : index
      %c0_16 = arith.constant 0 : index
      %17 = vector.load %arg7[%c0_15, %c0_16] : memref<768x512xbf16, #tpu.memory_space<vmem>>, vector<768x512xbf16>
      %cst_17 = arith.constant dense<0.000000e+00> : vector<128x512xf32>
      %18 = tpu.matmul %16, %17, %cst_17 {dimension_numbers = #tpu.dot_dimension_numbers<[1], [0], [0], [1], [0, 0, 1, 1], [], []>} : vector<128x768xbf16>, vector<768x512xbf16>, vector<128x512xf32> -> vector<128x512xf32>
      %c0_18 = arith.constant 0 : index
      %c0_19 = arith.constant 0 : index
      %19 = vector.load %arg8[%c0_18, %c0_19] : memref<1x512xf32, #tpu.memory_space<vmem>>, vector<1x512xf32>
      %20 = vector.broadcast %19 : vector<1x512xf32> to vector<128x512xf32>
      %21 = arith.addf %18, %20 : vector<128x512xf32>
      %22 = arith.mulf %21, %21 : vector<128x512xf32>
      %cst_20 = arith.constant dense<0.000000e+00> : vector<128xf32>
      %23 = vector.multi_reduction <add>, %22, %cst_20 [1] : vector<128x512xf32> to vector<128xf32>
      %24 = vector.shape_cast %23 : vector<128xf32> to vector<128x1xf32>
      %cst_21 = arith.constant 1.000000e-24 : f32
      %25 = vector.broadcast %cst_21 : f32 to vector<128x1xf32>
      %26 = arith.maximumf %24, %25 : vector<128x1xf32>
      %27 = math.rsqrt %26 : vector<128x1xf32>
      %28 = vector.broadcast %27 : vector<128x1xf32> to vector<128x512xf32>
      %29 = arith.mulf %21, %28 : vector<128x512xf32>
      %30 = arith.truncf %29 : vector<128x512xf32> to vector<128x512xbf16>
      %c0_22 = arith.constant 0 : index
      %c0_23 = arith.constant 0 : index
      %31 = vector.load %arg11[%c0_22, %c0_23] : memref<128x512xbf16, #tpu.memory_space<vmem>>, vector<128x512xbf16>
      tpu.vector_store %arg11[%c0_22, %c0_23], %30 {strides = array<i32>} : memref<128x512xbf16, #tpu.memory_space<vmem>>, vector<128x512xbf16>,
    } else {
    }
    %c0 = arith.constant 0 : index
    %c0_1 = arith.constant 0 : index
    %3 = vector.load %arg10[%c0, %c0_1] : memref<16x512xf32, #tpu.memory_space<vmem>>, vector<16x512xf32>
    %c0_2 = arith.constant 0 : index
    %c0_3 = arith.constant 0 : index
    %4 = vector.load %arg3[%c0_2, %c0_3] : memref<16x256xbf16, #tpu.memory_space<vmem>>, vector<16x256xbf16>
    %c0_4 = arith.constant 0 : index
    %c0_5 = arith.constant 0 : index
    %5 = vector.load %arg4[%c0_4, %c0_5] : memref<256x512xbf16, #tpu.memory_space<vmem>>, vector<256x512xbf16>
    %cst = arith.constant dense<0.000000e+00> : vector<16x512xf32>
    %6 = tpu.matmul %4, %5, %cst {dimension_numbers = #tpu.dot_dimension_numbers<[1], [0], [0], [1], [0, 0, 1, 1], [], []>} : vector<16x256xbf16>, vector<256x512xbf16>, vector<16x512xf32> -> vector<16x512xf32>
    %7 = arith.addf %3, %6 : vector<16x512xf32>
    %c0_6 = arith.constant 0 : index
    %c0_7 = arith.constant 0 : index
    %8 = vector.load %arg10[%c0_6, %c0_7] : memref<16x512xf32, #tpu.memory_space<vmem>>, vector<16x512xf32>
    tpu.vector_store %arg10[%c0_6, %c0_7], %7 {strides = array<i32>} : memref<16x512xf32, #tpu.memory_space<vmem>>, vector<16x512xf32>,
    %c7_i32 = arith.constant 7 : i32
    %9 = arith.cmpi eq, %arg1, %c7_i32 : i32
    %10 = arith.extui %9 : i1 to i32
    %c0_i32_8 = arith.constant 0 : i32
    %11 = arith.cmpi ne, %10, %c0_i32_8 : i32
    scf.if %11 {
      %c0_9 = arith.constant 0 : index
      %c0_10 = arith.constant 0 : index
      %12 = vector.load %arg10[%c0_9, %c0_10] : memref<16x512xf32, #tpu.memory_space<vmem>>, vector<16x512xf32>
      %13 = arith.mulf %12, %12 : vector<16x512xf32>
      %cst_11 = arith.constant dense<0.000000e+00> : vector<16xf32>
      %14 = vector.multi_reduction <add>, %13, %cst_11 [1] : vector<16x512xf32> to vector<16xf32>
      %15 = vector.shape_cast %14 : vector<16xf32> to vector<16x1xf32>
      %cst_12 = arith.constant 1.000000e-24 : f32
      %16 = vector.broadcast %cst_12 : f32 to vector<16x1xf32>
      %17 = arith.maximumf %15, %16 : vector<16x1xf32>
      %18 = math.rsqrt %17 : vector<16x1xf32>
      %c0_13 = arith.constant 0 : index
      %19 = memref.load %arg2[%c0_13] : memref<1xf32, #tpu.memory_space<smem>>
      %20 = vector.broadcast %19 : f32 to vector<16x1xf32>
      %21 = arith.mulf %18, %20 : vector<16x1xf32>
      %22 = vector.broadcast %21 : vector<16x1xf32> to vector<16x512xf32>
      %23 = arith.mulf %12, %22 : vector<16x512xf32>
      %24 = arith.truncf %23 : vector<16x512xf32> to vector<16x512xbf16>
      %c0_14 = arith.constant 0 : index
      %c0_15 = arith.constant 0 : index
      %25 = vector.load %arg11[%c0_14, %c0_15] : memref<128x512xbf16, #tpu.memory_space<vmem>>, vector<128x512xbf16>
      %cst_16 = arith.constant dense<0.000000e+00> : vector<16x128xf32>
      %26 = tpu.matmul %24, %25, %cst_16 {dimension_numbers = #tpu.dot_dimension_numbers<[1], [1], [0], [0], [0, 0, 1, 0], [], []>} : vector<16x512xbf16>, vector<128x512xbf16>, vector<16x128xf32> -> vector<16x128xf32>
      %c0_17 = arith.constant 0 : index
      %c0_18 = arith.constant 0 : index
      %27 = vector.load %arg9[%c0_17, %c0_18] : memref<16x128xf32, #tpu.memory_space<vmem>>, vector<16x128xf32>
      tpu.vector_store %arg9[%c0_17, %c0_18], %26 {strides = array<i32>} : memref<16x128xf32, #tpu.memory_space<vmem>>, vector<16x128xf32>,
    } else {
    }
    return
  }
  func.func @transform_0(%arg0: i32, %arg1: i32, %arg2: memref<1xf32, #tpu.memory_space<smem>>) -> (i32, i32) {
    %c0_i32 = arith.constant 0 : i32
    return %arg0, %arg1 : i32, i32
  }
  func.func @transform_1(%arg0: i32, %arg1: i32, %arg2: memref<1xf32, #tpu.memory_space<smem>>) -> (i32, i32) {
    %c0_i32 = arith.constant 0 : i32
    %c0_i32_0 = arith.constant 0 : i32
    return %arg1, %c0_i32 : i32, i32
  }
  func.func @transform_2(%arg0: i32, %arg1: i32, %arg2: memref<1xf32, #tpu.memory_space<smem>>) -> (i32, i32) {
    %c0_i32 = arith.constant 0 : i32
    %c0_i32_0 = arith.constant 0 : i32
    %c0_i32_1 = arith.constant 0 : i32
    return %c0_i32, %c0_i32_0 : i32, i32
  }
  func.func @transform_3(%arg0: i32, %arg1: i32, %arg2: memref<1xf32, #tpu.memory_space<smem>>) -> (i32, i32) {
    %c0_i32 = arith.constant 0 : i32
    %c0_i32_0 = arith.constant 0 : i32
    %c0_i32_1 = arith.constant 0 : i32
    return %c0_i32, %c0_i32_0 : i32, i32
  }
  func.func @transform_4(%arg0: i32, %arg1: i32, %arg2: memref<1xf32, #tpu.memory_space<smem>>) -> (i32, i32) {
    %c0_i32 = arith.constant 0 : i32
    %c0_i32_0 = arith.constant 0 : i32
    %c0_i32_1 = arith.constant 0 : i32
    return %c0_i32, %c0_i32_0 : i32, i32
  }
  func.func @transform_5(%arg0: i32, %arg1: i32, %arg2: memref<1xf32, #tpu.memory_space<smem>>) -> (i32, i32) {
    %c0_i32 = arith.constant 0 : i32
    %c0_i32_0 = arith.constant 0 : i32
    %c0_i32_1 = arith.constant 0 : i32
    return %c0_i32, %c0_i32_0 : i32, i32
  }
  func.func @transform_6(%arg0: i32, %arg1: i32, %arg2: memref<1xf32, #tpu.memory_space<smem>>) -> (i32, i32) {
    %c0_i32 = arith.constant 0 : i32
    %c0_i32_0 = arith.constant 0 : i32
    return %arg0, %c0_i32 : i32, i32
  }
}

</mosaic_0001>

<bundles_post_ra>
// kernel: tpu_custom_call.1
= control target key start
LH: loop header
LB: loop body
LE: loop exit
PB: predicated region body
PF: predicated region fallthrough
CT: control target
= control target key end

     0   :  { %s5967_s0 = inlined_call_operand.<no memory space> [shape: f32[1], index: 0, kind: input, shape index: {}]   ;;  %s5968_s1 = inlined_call_operand.hbm [shape: bf16[16,2048], index: 1, kind: input, shape index: {}]   ;;  %s5969_s2 = inlined_call_operand.hbm [shape: bf16[2048,512], index: 2, kind: input, shape index: {}]   ;;  %s5970_s3 = inlined_call_operand.hbm [shape: f32[1,512], index: 3, kind: input, shape index: {}]   ;;  %s5971_s4 = inlined_call_operand.hbm [shape: bf16[128,768], index: 4, kind: input, shape index: {}]   ;;  %s5972_s5 = inlined_call_operand.hbm [shape: bf16[768,512], index: 5, kind: input, shape index: {}]   ;;  %s5973_s6 = inlined_call_operand.hbm [shape: f32[1,512], index: 6, kind: input, shape index: {}]   ;;  %s5974_s7 = inlined_call_operand.hbm [shape: f32[16,128], index: 7, kind: output, shape index: {}]  }
   0x1   :  { %5999 = sst [smem:[#allocation43_spill]] %s5968_s1 }
   0x2   :  { %6000 = sst [smem:[#allocation44_spill]] %s5970_s3 }
   0x3   :  { %6001 = sst [smem:[#allocation45_spill]] %s5971_s4 }
   0x4   :  { %6002 = sst [smem:[#allocation46_spill]] %s5972_s5 }
   0x5   :  { %12 = sst [smem:[#allocation5]] %s5967_s0 }
   0x6   :  { %13 = vsyncpa [#allocation7], 0 }
   0x7   :  { %15 = vsyncpa [#allocation7 + $0x1], 0 }
   0x8   :  { %16 = vsyncpa [#allocation10], 0 }
   0x9   :  { %18 = vsyncpa [#allocation10 + $0x1], 0 }
   0xa   :  { %19 = vsyncpa [#allocation13], 0 }
   0xb   :  { %20 = vsyncpa [#allocation16], 0 }
   0xc   :  { %21 = vsyncpa [#allocation8], 0  ;;  %s5140_s26 = smov 0   ;;  %s5142_s27 = smov 0  }
   0xd   :  { %s5144_s28 = smov 0   ;;  %s5146_s29 = smov 0  }
   0xe   :  { %s5148_s30 = smov 0   ;;  %s5150_s8 = smov 0  }
   0xf LB: > { %s5169_s0 = sadd.s32 4294967295, %s5079_s8   ;;  %p61_p0 = scmp.ne.s32.totalorder %s5063_s27, %s5059_s26  ;;  %s5079_s8 = sphi %s5150_s8, %s27_s8   ;;  %s5075_s30 = sphi %s5148_s30, %s6064_s30   ;;  %s5071_s29 = sphi %s5146_s29, %s6063_s29   ;;  %s5067_s28 = sphi %s5144_s28, %s6062_s28   ;;  %s5063_s27 = sphi %s5142_s27, %s6061_s27   ;;  %s5059_s26 = sphi %s5140_s26, %s6060_s26  }
  0x10   : > { %p5975_p1 = scmp.eq.s32.totalorder %s5169_s0, 0  ;;  %p3670_p2 = scmp.ge.s32.totalorder %s5079_s8, 1 }
  0x11   : > { %p208_p3 = scmp.lt.s32.totalorder %s5079_s8, 9  ;;  %s5081_s11 = smov [#allocation11]  }
  0x12   : > { %p5177_p4 = por %p5975_p1, %p61_p0  ;;  %s221_s12 = sshll.u32 %s5081_s11, 4  ;;  %s222_s12 = int_to_ptr.vmem [resolvable:$true] %s221_s12 }
  0x13   : > { %p5181_p5 = pnand %p3670_p2, %p208_p3  ;;  %s5082_s13 = smov [#allocation12]  }
  0x14   : > { %s6003_s9 = scalar_select %p5177_p4, 1, 0 }
  0x15   : > { %s6004_s10 = scalar_select %p5181_p5, 1, 0 }
  0x16   : > { %p4223_p6 = pneg %p5181_p5  ;;  %s231_s14 = sshll.u32 %s5082_s13, 4  ;;  %s5193_s14 = int_to_ptr.vmem [resolvable:$true] %s231_s14 }
  0x17   : > { %s5083_s16 = smov [#allocation14]   ;;  %s6006_s3 = sld [smem:[#allocation44_spill]] }
  0x18   : > { %p5189_p7 = pnand %p4223_p6, %p5975_p1  ;;  %s5195_s17 = sshll.u32 %s5083_s16, 4  ;;  %s245_s17 = int_to_ptr.vmem [resolvable:$true] %s5195_s17 }
  0x1a   : > { %p5205_p9 = pneg %p5189_p7 }
  0x1d   : > { %s4811_s20 = scalar_lea.hbm %s6006_s3, 64 }
  0x1e   : > { %p4812_p8 = scmp.ne.s32.totalorder %s6006_s3, %s4811_s20  ;;  %p4818_p12 = scmp.lt.u32.totalorder %s4811_s20, %s6006_s3 }
  0x20   : > { %p4814_p10 = pnand %p5205_p9, %p4812_p8 }
  0x22   : > { %p4815_p11 = pneg %p4814_p10 }
  0x24   : > { %p4820_p13 = pnand %p4818_p12, %p4815_p11 }
  0x26   : > { %4823 = shalt.err (!%p4820_p13)
}
  0x27   : > { %s4824_s26 = scalar_lea.vmem %s222_s12, 64  ;;  %p4832_p6 = scmp.lt.s32.totalorder %s222_s12, %s222_s12 }
  0x28   : > { %p4825_p0 = scmp.ne.s32.totalorder %s222_s12, %s4824_s26  ;;  %p4833_p1 = scmp.lt.s32.totalorder %s4824_s26, %s4824_s26 }
  0x2a   : > { %p4827_p2 = pnand %p4825_p0, %p5205_p9  ;;  %p4834_p4 = por %p4833_p1, %p4832_p6 }
  0x2c   : > { %p4828_p3 = pneg %p4827_p2 }
  0x2e   : > { %p4835_p5 = pnand %p4834_p4, %p4828_p3 }
  0x30   : > { %4838 = shalt.err (!%p4835_p5)
}
  0x31   : > { %4226 = dma.hbm_to_vmem [thread:$0]  (!%p5189_p7), %s6006_s3, 64, %s222_s12, [#allocation10]  }
  0x32   : > { %s6008_s4 = sld [smem:[#allocation45_spill]] }
  0x38   : > { %s4839_s19 = scalar_lea.hbm %s6008_s4, 6144 }
  0x39   : > { %p4840_p8 = scmp.ne.s32.totalorder %s6008_s4, %s4839_s19  ;;  %p4846_p4 = scmp.lt.u32.totalorder %s4839_s19, %s6008_s4 }
  0x3b   : > { %p4842_p10 = pnand %p4840_p8, %p5205_p9 }
  0x3d   : > { %p4843_p1 = pneg %p4842_p10 }
  0x3f   : > { %p4848_p5 = pnand %p4846_p4, %p4843_p1 }
  0x41   : > { %4851 = shalt.err (!%p4848_p5)
}
  0x42   : > { %s4852_s12 = scalar_lea.vmem %s5193_s14, 6144  ;;  %p4860_p0 = scmp.lt.s32.totalorder %s5193_s14, %s5193_s14 }
  0x43   : > { %p4853_p11 = scmp.ne.s32.totalorder %s5193_s14, %s4852_s12  ;;  %p4861_p2 = scmp.lt.s32.totalorder %s4852_s12, %s4852_s12 }
  0x45   : > { %p4855_p12 = pnand %p4853_p11, %p5205_p9  ;;  %p4862_p3 = por %p4861_p2, %p4860_p0 }
  0x47   : > { %p4856_p13 = pneg %p4855_p12 }
  0x49   : > { %p4863_p6 = pnand %p4862_p3, %p4856_p13 }
  0x4b   : > { %4866 = shalt.err (!%p4863_p6)
}
  0x4c   : > { %s5084_s25 = smov 384   ;;  %s5085_s26 = smov 24  }
  0x4d   : > { %4229 = dma.hbm_to_vmem [thread:$0]  (!%p5189_p7), %s6008_s4, 6144, %s5193_s14, [#allocation13], %s5084_s25, %s5084_s25, %s5085_s26  }
  0x4e   : > { %s6009_s5 = sld [smem:[#allocation46_spill]] }
  0x54   : > { %s4867_s19 = scalar_lea.hbm %s6009_s5, 24576 }
  0x55   : > { %p4868_p8 = scmp.ne.s32.totalorder %s6009_s5, %s4867_s19  ;;  %p4874_p4 = scmp.lt.u32.totalorder %s4867_s19, %s6009_s5 }
  0x57   : > { %p4870_p10 = pnand %p4868_p8, %p5205_p9 }
  0x59   : > { %p4871_p1 = pneg %p4870_p10 }
  0x5b   : > { %p4876_p5 = pnand %p4874_p4, %p4871_p1 }
  0x5d   : > { %4879 = shalt.err (!%p4876_p5)
}
  0x5e   : > { %s4880_s12 = scalar_lea.vmem %s245_s17, 24576  ;;  %p4888_p0 = scmp.lt.s32.totalorder %s245_s17, %s245_s17 }
  0x5f   : > { %p4881_p11 = scmp.ne.s32.totalorder %s245_s17, %s4880_s12  ;;  %p4889_p2 = scmp.lt.s32.totalorder %s4880_s12, %s4880_s12 }
  0x61   : > { %p4883_p12 = pnand %p4881_p11, %p5205_p9  ;;  %p4890_p3 = por %p4889_p2, %p4888_p0 }
  0x63   : > { %p4884_p13 = pneg %p4883_p12 }
  0x65   : > { %p4891_p6 = pnand %p4890_p3, %p4884_p13 }
  0x67   : > { %4894 = shalt.err (!%p4891_p6)
}
  0x68   : > { %s5978_s14 = smov 256   ;;  %s5979_s25 = smov 16  }
  0x69   : > { %4232 = dma.hbm_to_vmem [thread:$0]  (!%p5189_p7), %s6009_s5, 24576, %s245_s17, [#allocation13], %s5978_s14, %s5978_s14, %s5979_s25  }
  0x6a   : > { %s5088_s13 = smov [#allocation15]   ;;  %s4895_s20 = scalar_lea.hbm %s5973_s6, 64 }
  0x6b   : > { %s258_s16 = sshll.u32 %s5088_s13, 4  ;;  %p4896_p8 = scmp.ne.s32.totalorder %s5973_s6, %s4895_s20  ;;  %s259_s16 = int_to_ptr.vmem [resolvable:$true] %s258_s16 }
  0x6c   : > { %p4902_p4 = scmp.lt.u32.totalorder %s4895_s20, %s5973_s6 }
  0x6d   : > { %p4898_p10 = pnand %p4896_p8, %p5205_p9 }
  0x6f   : > { %p4899_p1 = pneg %p4898_p10 }
  0x71   : > { %p4904_p5 = pnand %p4902_p4, %p4899_p1 }
  0x73   : > { %4907 = shalt.err (!%p4904_p5)
}
  0x74   : > { %s4908_s17 = scalar_lea.vmem %s259_s16, 64  ;;  %p4916_p0 = scmp.lt.s32.totalorder %s259_s16, %s259_s16 }
  0x75   : > { %p4909_p11 = scmp.ne.s32.totalorder %s259_s16, %s4908_s17  ;;  %p4917_p2 = scmp.lt.s32.totalorder %s4908_s17, %s4908_s17 }
  0x77   : > { %p4911_p12 = pnand %p4909_p11, %p5205_p9  ;;  %p4918_p3 = por %p4917_p2, %p4916_p0 }
  0x79   : > { %p4912_p13 = pneg %p4911_p12 }
  0x7b   : > { %p4919_p6 = pnand %p4918_p3, %p4912_p13 }
  0x7d   : > { %4922 = shalt.err (!%p4919_p6)
}
  0x7e   : > { %4235 = dma.hbm_to_vmem [thread:$0]  (!%p5189_p7), %s5973_s6, 64, %s259_s16, [#allocation16]  }
  0x7f   : > { %s36_s23 = sadd.s32 1, %s5075_s30  ;;  %s48_s13 = sadd.s32 1, %s5067_s28 }
  0x80   : > { %p37_p9 = scmp.ge.s32.totalorder %s36_s23, 8  ;;  %p55_p8 = scmp.ne.s32.totalorder %s5067_s28, %s5063_s27 }
  0x81   : > { %p56_p10 = scmp.eq.s32.totalorder %s5079_s8, 0  ;;  %p4247_p1 = scmp.lt.s32.totalorder %s5079_s8, 8 }
  0x82   : > { %s6066_s23 = smov (%p37_p9, %s36_s23), 0  ;;  %s5293_s15 = sand.u32 1, %s5067_s28  }
  0x83   : > { %p57_p4 = por %p56_p10, %p55_p8  ;;  %s44_s18 = ssub.s32 %s5075_s30, %s6066_s23 }
  0x84   : > { %p46_p5 = scmp.eq.s32.totalorder %s44_s18, 0  ;;  %s3676_s19 = sshll.u32 %s5293_s15, 4 }
  0x85   : > { %s4002_s20 = sshll.u32 %s5075_s30, 7  ;;  %s6010_s1 = sld [smem:[#allocation43_spill]] }
  0x86   : > { %s5300_s16 = scalar_select %p46_p5, %s5067_s28, %s48_s13  }
  0x87   : > { %s273_s12 = scalar_lea.vmem [#allocation6], %s3676_s19  ;;  %p5311_p7 = pnand %p4247_p1, %p57_p4 }
  0x88   : > { %s283_s17 = sshll.u32 %s273_s12, 4  ;;  %s270_s11 = scalar_lea.sflag [#allocation7], %s5293_s15  ;;  %s5307_s17 = int_to_ptr.vmem [resolvable:$true] %s283_s17 }
  0x89   : > { %p4925_p12 = pneg %p5311_p7 }
  0x8b   : > { %s5305_s24 = scalar_lea.hbm %s6010_s1, %s4002_s20  ;;  %s4928_s20 = scalar_lea.hbm %s6010_s1, 2048 }
  0x8c   : > { %s4923_s13 = scalar_lea.hbm %s5305_s24, 256  ;;  %p4929_p2 = scmp.lt.u32.totalorder %s5305_s24, %s6010_s1 }
  0x8d   : > { %p4924_p11 = scmp.ne.s32.totalorder %s5305_s24, %s4923_s13  ;;  %p4930_p3 = scmp.lt.u32.totalorder %s4928_s20, %s4923_s13 }
  0x8e   : > { %p4932_p9 = scmp.lt.u32.totalorder %s4923_s13, %s5305_s24 }
  0x8f   : > { %p4926_p13 = pnand %p4925_p12, %p4924_p11  ;;  %p4931_p6 = por %p4930_p3, %p4929_p2 }
  0x91   : > { %p4927_p0 = pneg %p4926_p13  ;;  %p4933_p8 = por %p4932_p9, %p4931_p6 }
  0x93   : > { %p4934_p10 = pnand %p4933_p8, %p4927_p0 }
  0x95   : > { %4937 = shalt.err (!%p4934_p10)
}
  0x96   : > { %s4938_s12 = scalar_lea.vmem %s5307_s17, 256  ;;  %s5089_s18 = smov [#allocation6]  }
  0x97   : > { %p4939_p1 = scmp.ne.s32.totalorder %s5307_s17, %s4938_s12  ;;  %s4943_s19 = sshll.u32 %s5089_s18, 4  ;;  %s4944_s19 = int_to_ptr.vmem [resolvable:$false] %s4943_s19 }
  0x98   : > { %s4945_s21 = scalar_lea.vmem %s4944_s19, 512  ;;  %p4946_p11 = scmp.lt.s32.totalorder %s5307_s17, %s4944_s19 }
  0x99   : > { %p4941_p4 = pnand %p4939_p1, %p4925_p12  ;;  %p4947_p13 = scmp.lt.s32.totalorder %s4945_s21, %s4938_s12 }
  0x9b   : > { %p4942_p5 = pneg %p4941_p4  ;;  %p4948_p2 = por %p4947_p13, %p4946_p11 }
  0x9d   : > { %p4949_p3 = pnand %p4948_p2, %p4942_p5 }
  0x9f   : > { %4952 = shalt.err (!%p4949_p3)
}
  0xa0   : > { %s5090_s13 = smov 1024   ;;  %s5091_s20 = smov 128  }
  0xa1   : > { %s5092_s22 = smov 8   ;;  %s293_s18 = sand.u32 1, %s5079_s8  }
  0xa2   : > { %4239 = dma.hbm_to_vmem [thread:$0]  (!%p5311_p7), %s5305_s24, 256, %s5307_s17, %s270_s11, %s5090_s13, %s5091_s20, %s5092_s22  }
  0xa3   : > { %s3679_s19 = sshll.u32 %s5293_s15, 9  ;;  %s4004_s12 = sshll.u32 %s5075_s30, 13 }
  0xa4   : > { %s297_s21 = scalar_lea.vmem [#allocation9], %s3679_s19  ;;  %s5349_s3 = scalar_lea.hbm %s5969_s2, %s4004_s12 }
  0xa5   : > { %s305_s14 = sshll.u32 %s297_s21, 4  ;;  %s5353_s4 = scalar_lea.sflag [#allocation10], %s293_s18  ;;  %s5351_s14 = int_to_ptr.vmem [resolvable:$true] %s305_s14 }
  0xa6   : > { %s4953_s5 = scalar_lea.hbm %s5349_s3, 8192  ;;  %s4958_s1 = scalar_lea.hbm %s5969_s2, 65536 }
  0xa7   : > { %p4954_p0 = scmp.ne.s32.totalorder %s5349_s3, %s4953_s5  ;;  %p4959_p8 = scmp.lt.u32.totalorder %s5349_s3, %s5969_s2 }
  0xa8   : > { %p4960_p10 = scmp.lt.u32.totalorder %s4958_s1, %s4953_s5  ;;  %p4962_p4 = scmp.lt.u32.totalorder %s4953_s5, %s5349_s3 }
  0xa9   : > { %p4956_p6 = pnand %p4954_p0, %p4925_p12 }
  0xaa   : > { %p4961_p1 = por %p4960_p10, %p4959_p8 }
  0xab   : > { %p4957_p9 = pneg %p4956_p6 }
  0xac   : > { %p4963_p5 = por %p4962_p4, %p4961_p1 }
  0xae   : > { %p4964_p11 = pnand %p4963_p5, %p4957_p9 }
  0xb0   : > { %4967 = shalt.err (!%p4964_p11)
}
  0xb1   : > { %s4968_s11 = scalar_lea.vmem %s5351_s14, 8192  ;;  %s5093_s13 = smov [#allocation9]  }
  0xb2   : > { %p4969_p13 = scmp.ne.s32.totalorder %s5351_s14, %s4968_s11  ;;  %s4973_s20 = sshll.u32 %s5093_s13, 4  ;;  %s4974_s20 = int_to_ptr.vmem [resolvable:$false] %s4973_s20 }
  0xb3   : > { %s4975_s22 = scalar_lea.vmem %s4974_s20, 16384  ;;  %p4976_p0 = scmp.lt.s32.totalorder %s5351_s14, %s4974_s20 }
  0xb4   : > { %p4971_p2 = pnand %p4969_p13, %p4925_p12  ;;  %p4977_p6 = scmp.lt.s32.totalorder %s4975_s22, %s4968_s11 }
  0xb6   : > { %p4972_p3 = pneg %p4971_p2  ;;  %p4978_p8 = por %p4977_p6, %p4976_p0 }
  0xb8   : > { %p4979_p10 = pnand %p4978_p8, %p4972_p3 }
  0xba   : > { %4982 = shalt.err (!%p4979_p10)
}
  0xbb   : > { %s6012_s5 = smov 16   ;;  %s6013_s18 = smov 256  }
  0xbc   : > { %4242 = dma.hbm_to_vmem [thread:$0]  (!%p5311_p7), %s5349_s3, 8192, %s5351_s14, %s5353_s4, %s6013_s18, %s6013_s18, %s6012_s5  }
  0xbd   : > { %p6014_p12 = scmp.ne.s32.totalorder %s6004_s10, 0 }
  0xbe   : > { %s319_s19 = sand.u32 (!%p6014_p12), 1, %s5063_s27   ;;  %p6015_p9 = scmp.ne.s32.totalorder (!%p6014_p12), %s6003_s9, 0 }
  0xbf   : > { %317 = sbr.rel (%p6014_p12) target bundleno = 1561 (0x619), region = 44  ;;  %s3684_s12 = sshll.u32 (!%p6014_p12), %s319_s19, 4 }
  0xc0   : > { %s320_s21 = scalar_lea.sflag (!%p6014_p12), [#allocation7], %s319_s19  ;;  %s5385_s15 = scalar_lea.vmem (!%p6014_p12), [#allocation6], %s3684_s12 }
  0xc6   : > { %5034 = dma.done.wait (%p6015_p9), %s320_s21, 256  }
  0xc7   : > { %5036 = vsyncadd (%p6015_p9), %s320_s21, 4294967040  ;;  %s328_s26 = sand.u32 1, %s5169_s0   ;;  %s3685_s24 = sshll.u32 %s319_s19, 9 }
  0xc8   : > { %s329_s3 = scalar_lea.sflag [#allocation10], %s328_s26  ;;  %s5392_s4 = scalar_lea.vmem [#allocation9], %s3685_s24 }
  0xc9   : > { %5038 = dma.done.wait (%p6015_p9), %s329_s3, 8192  }
  0xca   : > { %5040 = vsyncadd (%p6015_p9), %s329_s3, 4294959104  ;;  %p6016_p7 = scmp.eq.s32.totalorder %s5169_s0, 0 }
  0xcc   : > { %5042 = dma.done.wait (%p6016_p7), [#allocation10], 64   ;;  %p6017_p1 = pmov %p6016_p7 }
  0xce   : > { %5044 = vsyncadd (%p6017_p1), [#allocation10], 4294967232  ;;  %p6018_p4 = pmov %p6017_p1 }
  0xcf   : > { %p6019_p5 = pmov %p6017_p1 }
  0xd0   : > { %5046 = dma.done.wait (%p6018_p4), [#allocation13], 30720  }
  0xd1   : > { %5048 = vsyncadd (%p6019_p5), [#allocation13], 4294936576  ;;  %p6020_p11 = pmov %p6017_p1 }
  0xd2   : > { %p6021_p13 = pmov %p6017_p1 }
  0xd3   : > { %5050 = dma.done.wait (%p6020_p11), [#allocation16], 64  }
  0xd4   : > { %5052 = vsyncadd (%p6021_p13), [#allocation16], 4294967232  ;;  %p3690_p2 = scmp.ne.s32.totalorder %s5071_s29, 0 }
  0xd6   : > { %385 = sbr.rel (%p3690_p2) target bundleno = 856 (0x358), region = 72 }
  0xdd   : > { %v4316_v0 = vld [vmem:[#allocation14 + $0x4] ss:$16 sps:$4 sm:$0xff]   ;;  %v4318_v1 = vld [vmem:[#allocation14 + $0xc] ss:$16 sps:$4 sm:$0xff]   ;;  %v4320_v2 = vld [vmem:[#allocation14] ss:$16 sps:$4 sm:$0xff]  }
  0xde   : > { %1878 = vmatprep.subr.bf16.mxu0 %v4316_v0  ;;  %v4321_v3 = vld [vmem:[#allocation14 + $0x8] ss:$16 sps:$4 sm:$0xff]   ;;  %2217 = vmatprep.subr.bf16.mxu1 %v4318_v1  ;;  %v4322_v4 = vld [vmem:[#allocation14 + $0x24] ss:$16 sps:$4 sm:$0xff]   ;;  %v4324_v5 = vld [vmem:[#allocation14 + $0x2c] ss:$16 sps:$4 sm:$0xff]  }
  0xdf   : > { %1879 = vmatpush1.bf16.msra.mxu0 %v4320_v2  ;;  %2218 = vmatpush1.bf16.msra.mxu1 %v4321_v3  ;;  %v4326_v6 = vld [vmem:[#allocation14 + $0x20] ss:$16 sps:$4 sm:$0xff]   ;;  %v4327_v7 = vld [vmem:[#allocation14 + $0x28] ss:$16 sps:$4 sm:$0xff]   ;;  %v4328_v8 = vld [vmem:[#allocation14 + $0x44] ss:$16 sps:$4 sm:$0xff]  }
  0xe0   : > { %1880 = vmatprep.subr.bf16.mxu0 %v4322_v4  ;;  %2219 = vmatprep.subr.bf16.mxu1 %v4324_v5  ;;  %v4330_v9 = vld [vmem:[#allocation14 + $0x4c] ss:$16 sps:$4 sm:$0xff]   ;;  %v4332_v10 = vld [vmem:[#allocation14 + $0x40] ss:$16 sps:$4 sm:$0xff]   ;;  %v4333_v11 = vld [vmem:[#allocation14 + $0x48] ss:$16 sps:$4 sm:$0xff]  }
  0xe1   : > { %v4334_v12 = vld [vmem:[#allocation14 + $0x64] ss:$16 sps:$4 sm:$0xff]   ;;  %v4336_v13 = vld [vmem:[#allocation14 + $0x6c] ss:$16 sps:$4 sm:$0xff]   ;;  %v4338_v14 = vld [vmem:[#allocation14 + $0x60] ss:$16 sps:$4 sm:$0xff]  }
  0xe2   : > { %v4339_v15 = vld [vmem:[#allocation14 + $0x68] ss:$16 sps:$4 sm:$0xff]   ;;  %v4340_v16 = vld [vmem:[#allocation14 + $0x84] ss:$16 sps:$4 sm:$0xff]   ;;  %v4342_v17 = vld [vmem:[#allocation14 + $0x8c] ss:$16 sps:$4 sm:$0xff]  }
  0xe3   : > { %1881 = vmatpush1.bf16.msra.mxu0 %v4326_v6  ;;  %2220 = vmatpush1.bf16.msra.mxu1 %v4327_v7  ;;  %v4344_v18 = vld [vmem:[#allocation14 + $0x80] ss:$16 sps:$4 sm:$0xff]   ;;  %v4345_v19 = vld [vmem:[#allocation14 + $0x88] ss:$16 sps:$4 sm:$0xff]   ;;  %v4346_v20 = vld [vmem:[#allocation14 + $0xa4] ss:$16 sps:$4 sm:$0xff]  }
  0xe4   : > { %1882 = vmatprep.subr.bf16.mxu0 %v4328_v8  ;;  %2221 = vmatprep.subr.bf16.mxu1 %v4330_v9  ;;  %v4348_v21 = vld [vmem:[#allocation14 + $0xac] ss:$16 sps:$4 sm:$0xff]   ;;  %v4350_v22 = vld [vmem:[#allocation14 + $0xa0] ss:$16 sps:$4 sm:$0xff]   ;;  %v4351_v23 = vld [vmem:[#allocation14 + $0xa8] ss:$16 sps:$4 sm:$0xff]  }
  0xe5   : > { %v4352_v24 = vld [vmem:[#allocation14 + $0xc4] ss:$16 sps:$4 sm:$0xff]   ;;  %v4354_v25 = vld [vmem:[#allocation14 + $0xcc] ss:$16 sps:$4 sm:$0xff]   ;;  %v4356_v26 = vld [vmem:[#allocation14 + $0xc0] ss:$16 sps:$4 sm:$0xff]  }
  0xe6   : > { %v4357_v27 = vld [vmem:[#allocation14 + $0xc8] ss:$16 sps:$4 sm:$0xff]   ;;  %v4358_v28 = vld [vmem:[#allocation14 + $0xe4] ss:$16 sps:$4 sm:$0xff]   ;;  %v4360_v29 = vld [vmem:[#allocation14 + $0xec] ss:$16 sps:$4 sm:$0xff]  }
  0xe7   : > { %1883 = vmatpush1.bf16.msra.mxu0 %v4332_v10  ;;  %2222 = vmatpush1.bf16.msra.mxu1 %v4333_v11  ;;  %v4362_v30 = vld [vmem:[#allocation14 + $0xe0] ss:$16 sps:$4 sm:$0xff]   ;;  %v4363_v31 = vld [vmem:[#allocation14 + $0xe8] ss:$16 sps:$4 sm:$0xff]   ;;  %v4364_v32 = vld [vmem:[#allocation14 + $0x104] ss:$16 sps:$4 sm:$0xff]  }
  0xe8   : > { %1884 = vmatprep.subr.bf16.mxu0 %v4334_v12  ;;  %2223 = vmatprep.subr.bf16.mxu1 %v4336_v13  ;;  %v4366_v33 = vld [vmem:[#allocation14 + $0x10c] ss:$16 sps:$4 sm:$0xff]   ;;  %v4368_v34 = vld [vmem:[#allocation14 + $0x100] ss:$16 sps:$4 sm:$0xff]   ;;  %v4369_v35 = vld [vmem:[#allocation14 + $0x108] ss:$16 sps:$4 sm:$0xff]  }
  0xe9   : > { %v4370_v36 = vld [vmem:[#allocation14 + $0x124] ss:$16 sps:$4 sm:$0xff]   ;;  %v4372_v37 = vld [vmem:[#allocation14 + $0x12c] ss:$16 sps:$4 sm:$0xff]   ;;  %v4374_v38 = vld [vmem:[#allocation14 + $0x120] ss:$16 sps:$4 sm:$0xff]  }
  0xea   : > { %v4375_v39 = vld [vmem:[#allocation14 + $0x128] ss:$16 sps:$4 sm:$0xff]   ;;  %v4376_v40 = vld [vmem:[#allocation14 + $0x144] ss:$16 sps:$4 sm:$0xff]   ;;  %v4378_v41 = vld [vmem:[#allocation14 + $0x14c] ss:$16 sps:$4 sm:$0xff]  }
  0xeb   : > { %1885 = vmatpush1.bf16.msra.mxu0 %v4338_v14  ;;  %2224 = vmatpush1.bf16.msra.mxu1 %v4339_v15  ;;  %v4380_v42 = vld [vmem:[#allocation14 + $0x140] ss:$16 sps:$4 sm:$0xff]   ;;  %v4381_v43 = vld [vmem:[#allocation14 + $0x148] ss:$16 sps:$4 sm:$0xff]   ;;  %v4382_v44 = vld [vmem:[#allocation14 + $0x164] ss:$16 sps:$4 sm:$0xff]  }
  0xec   : > { %1886 = vmatprep.subr.bf16.mxu0 %v4340_v16  ;;  %2225 = vmatprep.subr.bf16.mxu1 %v4342_v17  ;;  %v4384_v45 = vld [vmem:[#allocation14 + $0x16c] ss:$16 sps:$4 sm:$0xff]   ;;  %v4386_v46 = vld [vmem:[#allocation14 + $0x160] ss:$16 sps:$4 sm:$0xff]   ;;  %v4387_v47 = vld [vmem:[#allocation14 + $0x168] ss:$16 sps:$4 sm:$0xff]  }
  0xed   : > { %v4414_v48 = vld [vmem:[#allocation12 + $0x4] ss:$24 sps:$4 sm:$0xff]   ;;  %v4392_v51 = vld [vmem:[#allocation14 + $0x180] ss:$16 sps:$4 sm:$0xff]   ;;  %v4393_v52 = vld [vmem:[#allocation14 + $0x188] ss:$16 sps:$4 sm:$0xff]  }
  0xee   : > { %v4388_v49 = vld [vmem:[#allocation14 + $0x184] ss:$16 sps:$4 sm:$0xff]   ;;  %v4390_v50 = vld [vmem:[#allocation14 + $0x18c] ss:$16 sps:$4 sm:$0xff]   ;;  %1910 = vmatprep.mubr.bf16.mxu0 %v4414_v48  ;;  %2249 = vmatprep.mubr.bf16.mxu1 %v4414_v48  ;;  %v4398_v55 = vld [vmem:[#allocation14 + $0x1a0] ss:$16 sps:$4 sm:$0xff]  }
  0xef   : > { %1887 = vmatpush1.bf16.msra.mxu0 %v4344_v18  ;;  %2226 = vmatpush1.bf16.msra.mxu1 %v4345_v19  ;;  %v4394_v53 = vld [vmem:[#allocation14 + $0x1a4] ss:$16 sps:$4 sm:$0xff]   ;;  %v4396_v54 = vld [vmem:[#allocation14 + $0x1ac] ss:$16 sps:$4 sm:$0xff]   ;;  %v4399_v56 = vld [vmem:[#allocation14 + $0x1a8] ss:$16 sps:$4 sm:$0xff]  }
  0xf0   : > { %1888 = vmatprep.subr.bf16.mxu0 %v4346_v20  ;;  %2227 = vmatprep.subr.bf16.mxu1 %v4348_v21  ;;  %v4400_v57 = vld [vmem:[#allocation14 + $0x1c4] ss:$16 sps:$4 sm:$0xff]   ;;  %v4402_v58 = vld [vmem:[#allocation14 + $0x1cc] ss:$16 sps:$4 sm:$0xff]   ;;  %v4404_v59 = vld [vmem:[#allocation14 + $0x1c0] ss:$16 sps:$4 sm:$0xff]  }
  0xf1   : > { %v4405_v60 = vld [vmem:[#allocation14 + $0x1c8] ss:$16 sps:$4 sm:$0xff]   ;;  %v4406_v61 = vld [vmem:[#allocation14 + $0x1e4] ss:$16 sps:$4 sm:$0xff]   ;;  %v4408_v62 = vld [vmem:[#allocation14 + $0x1ec] ss:$16 sps:$4 sm:$0xff]  }
  0xf2   : > { %v4410_v63 = vld [vmem:[#allocation14 + $0x1e0] ss:$16 sps:$4 sm:$0xff]   ;;  %v4411_v0 = vld [vmem:[#allocation14 + $0x1e8] ss:$16 sps:$4 sm:$0xff]   ;;  %v4417_v1 = vld [vmem:[#allocation14 + $0x204] ss:$16 sps:$4 sm:$0xff]  }
  0xf3   : > { %1889 = vmatpush1.bf16.msra.mxu0 %v4350_v22  ;;  %2228 = vmatpush1.bf16.msra.mxu1 %v4351_v23  ;;  %v4420_v2 = vld [vmem:[#allocation14 + $0x20c] ss:$16 sps:$4 sm:$0xff]   ;;  %v4412_v3 = vld [vmem:[#allocation12] ss:$24 sps:$4 sm:$0xff]   ;;  %v4423_v6 = vld [vmem:[#allocation14 + $0x224] ss:$16 sps:$4 sm:$0xff]  }
  0xf4   : > { %1890 = vmatprep.subr.bf16.mxu0 %v4352_v24  ;;  %2229 = vmatprep.subr.bf16.mxu1 %v4354_v25  ;;  %v4415_v4 = vld [vmem:[#allocation14 + $0x200] ss:$16 sps:$4 sm:$0xff]   ;;  %v4418_v5 = vld [vmem:[#allocation14 + $0x208] ss:$16 sps:$4 sm:$0xff]   ;;  %v4426_v7 = vld [vmem:[#allocation14 + $0x22c] ss:$16 sps:$4 sm:$0xff]  }
  0xf5   : > { %v4427_v8 = vld [vmem:[#allocation12 + $0x34] ss:$24 sps:$4 sm:$0xff]   ;;  %v4421_v9 = vld [vmem:[#allocation14 + $0x220] ss:$16 sps:$4 sm:$0xff]   ;;  %v4424_v10 = vld [vmem:[#allocation14 + $0x228] ss:$16 sps:$4 sm:$0xff]  }
  0xf6   : > { %v4432_v11 = vld [vmem:[#allocation14 + $0x244] ss:$16 sps:$4 sm:$0xff]   ;;  %v4435_v12 = vld [vmem:[#allocation14 + $0x24c] ss:$16 sps:$4 sm:$0xff]   ;;  %v4429_v13 = vld [vmem:[#allocation12 + $0x30] ss:$24 sps:$4 sm:$0xff]  }
  0xf7   : > { %1891 = vmatpush1.bf16.msra.mxu0 %v4356_v26  ;;  %2230 = vmatpush1.bf16.msra.mxu1 %v4357_v27  ;;  %v4430_v14 = vld [vmem:[#allocation14 + $0x240] ss:$16 sps:$4 sm:$0xff]   ;;  %v4433_v15 = vld [vmem:[#allocation14 + $0x248] ss:$16 sps:$4 sm:$0xff]   ;;  %v4438_v16 = vld [vmem:[#allocation14 + $0x264] ss:$16 sps:$4 sm:$0xff]  }
  0xf8   : > { %1892 = vmatprep.subr.bf16.mxu0 %v4358_v28  ;;  %2231 = vmatprep.subr.bf16.mxu1 %v4360_v29  ;;  %v4441_v17 = vld [vmem:[#allocation14 + $0x26c] ss:$16 sps:$4 sm:$0xff]   ;;  %v4436_v19 = vld [vmem:[#allocation14 + $0x260] ss:$16 sps:$4 sm:$0xff]   ;;  %v4439_v20 = vld [vmem:[#allocation14 + $0x268] ss:$16 sps:$4 sm:$0xff]  }
  0xf9   : > { %v4442_v18 = vld [vmem:[#allocation12 + $0x64] ss:$24 sps:$4 sm:$0xff]   ;;  %v4444_v23 = vld [vmem:[#allocation12 + $0x60] ss:$24 sps:$4 sm:$0xff]   ;;  %v4457_v28 = vld [vmem:[#allocation12 + $0x94] ss:$24 sps:$4 sm:$0xff]  }
  0xfa   : > { %v4447_v21 = vld [vmem:[#allocation14 + $0x284] ss:$16 sps:$4 sm:$0xff]   ;;  %v4450_v22 = vld [vmem:[#allocation14 + $0x28c] ss:$16 sps:$4 sm:$0xff]   ;;  %v4445_v24 = vld [vmem:[#allocation14 + $0x280] ss:$16 sps:$4 sm:$0xff]  }
  0xfb   : > { %1893 = vmatpush1.bf16.msra.mxu0 %v4362_v30  ;;  %2232 = vmatpush1.bf16.msra.mxu1 %v4363_v31  ;;  %v4448_v25 = vld [vmem:[#allocation14 + $0x288] ss:$16 sps:$4 sm:$0xff]   ;;  %v4453_v26 = vld [vmem:[#allocation14 + $0x2a4] ss:$16 sps:$4 sm:$0xff]   ;;  %v4456_v27 = vld [vmem:[#allocation14 + $0x2ac] ss:$16 sps:$4 sm:$0xff]  }
  0xfc   : > { %1894 = vmatprep.subr.bf16.mxu0 %v4364_v32  ;;  %2233 = vmatprep.subr.bf16.mxu1 %v4366_v33  ;;  %v4451_v29 = vld [vmem:[#allocation14 + $0x2a0] ss:$16 sps:$4 sm:$0xff]   ;;  %v4454_v30 = vld [vmem:[#allocation14 + $0x2a8] ss:$16 sps:$4 sm:$0xff]   ;;  %v4462_v31 = vld [vmem:[#allocation14 + $0x2c4] ss:$16 sps:$4 sm:$0xff]  }
  0xfd   : > { %v4465_v32 = vld [vmem:[#allocation14 + $0x2cc] ss:$16 sps:$4 sm:$0xff]   ;;  %v4459_v33 = vld [vmem:[#allocation12 + $0x90] ss:$24 sps:$4 sm:$0xff]  }
  0xfe   : > { %v4487_v48 = vld [vmem:[#allocation12 + $0xf4] ss:$24 sps:$4 sm:$0xff]  }
  0xff   : > { %1895 = vmatpush1.bf16.msra.mxu0 %v4368_v34  ;;  %2234 = vmatpush1.bf16.msra.mxu1 %v4369_v35  ;;  %v4460_v34 = vld [vmem:[#allocation14 + $0x2c0] ss:$16 sps:$4 sm:$0xff]   ;;  %v4463_v35 = vld [vmem:[#allocation14 + $0x2c8] ss:$16 sps:$4 sm:$0xff]  }
 0x100   : > { %1896 = vmatprep.subr.bf16.mxu0 %v4370_v36  ;;  %2235 = vmatprep.subr.bf16.mxu1 %v4372_v37  ;;  %v4468_v36 = vld [vmem:[#allocation14 + $0x2e4] ss:$16 sps:$4 sm:$0xff]   ;;  %v4471_v37 = vld [vmem:[#allocation14 + $0x2ec] ss:$16 sps:$4 sm:$0xff]  }
 0x103   : > { %1897 = vmatpush1.bf16.msra.mxu0 %v4374_v38  ;;  %2236 = vmatpush1.bf16.msra.mxu1 %v4375_v39  ;;  %v4472_v38 = vld [vmem:[#allocation12 + $0xc4] ss:$24 sps:$4 sm:$0xff]   ;;  %v4466_v39 = vld [vmem:[#allocation14 + $0x2e0] ss:$16 sps:$4 sm:$0xff]  }
 0x104   : > { %1898 = vmatprep.subr.bf16.mxu0 %v4376_v40  ;;  %2237 = vmatprep.subr.bf16.mxu1 %v4378_v41  ;;  %v4469_v40 = vld [vmem:[#allocation14 + $0x2e8] ss:$16 sps:$4 sm:$0xff]   ;;  %v4477_v41 = vld [vmem:[#allocation14 + $0x304] ss:$16 sps:$4 sm:$0xff]  }
 0x107   : > { %1899 = vmatpush1.bf16.msra.mxu0 %v4380_v42  ;;  %2238 = vmatpush1.bf16.msra.mxu1 %v4381_v43  ;;  %v4480_v42 = vld [vmem:[#allocation14 + $0x30c] ss:$16 sps:$4 sm:$0xff]   ;;  %v4474_v43 = vld [vmem:[#allocation12 + $0xc0] ss:$24 sps:$4 sm:$0xff]  }
 0x108   : > { %1900 = vmatprep.subr.bf16.mxu0 %v4382_v44  ;;  %2239 = vmatprep.subr.bf16.mxu1 %v4384_v45  ;;  %v4475_v44 = vld [vmem:[#allocation14 + $0x300] ss:$16 sps:$4 sm:$0xff]   ;;  %v4478_v45 = vld [vmem:[#allocation14 + $0x308] ss:$16 sps:$4 sm:$0xff]  }
 0x10b   : > { %1901 = vmatpush1.bf16.msra.mxu0 %v4386_v46  ;;  %2240 = vmatpush1.bf16.msra.mxu1 %v4387_v47  ;;  %v4483_v46 = vld [vmem:[#allocation14 + $0x324] ss:$16 sps:$4 sm:$0xff]   ;;  %v4486_v47 = vld [vmem:[#allocation14 + $0x32c] ss:$16 sps:$4 sm:$0xff]  }
 0x10c   : > { %1902 = vmatprep.subr.bf16.mxu0 %v4388_v49  ;;  %2241 = vmatprep.subr.bf16.mxu1 %v4390_v50  ;;  %v4481_v49 = vld [vmem:[#allocation14 + $0x320] ss:$16 sps:$4 sm:$0xff]   ;;  %v4484_v50 = vld [vmem:[#allocation14 + $0x328] ss:$16 sps:$4 sm:$0xff]  }
 0x10f   : > { %1903 = vmatpush1.bf16.msra.mxu0 %v4392_v51  ;;  %2242 = vmatpush1.bf16.msra.mxu1 %v4393_v52  ;;  %v4492_v51 = vld [vmem:[#allocation14 + $0x344] ss:$16 sps:$4 sm:$0xff]   ;;  %v4495_v52 = vld [vmem:[#allocation14 + $0x34c] ss:$16 sps:$4 sm:$0xff]  }
 0x110   : > { %1904 = vmatprep.subr.bf16.mxu0 %v4394_v53  ;;  %2243 = vmatprep.subr.bf16.mxu1 %v4396_v54  ;;  %v4489_v53 = vld [vmem:[#allocation12 + $0xf0] ss:$24 sps:$4 sm:$0xff]  }
 0x111   : > { %v4490_v54 = vld [vmem:[#allocation14 + $0x340] ss:$16 sps:$4 sm:$0xff]  }
 0x113   : > { %1905 = vmatpush1.bf16.msra.mxu0 %v4398_v55  ;;  %2244 = vmatpush1.bf16.msra.mxu1 %v4399_v56  ;;  %v4493_v55 = vld [vmem:[#allocation14 + $0x348] ss:$16 sps:$4 sm:$0xff]   ;;  %v4498_v56 = vld [vmem:[#allocation14 + $0x364] ss:$16 sps:$4 sm:$0xff]  }
 0x114   : > { %1906 = vmatprep.subr.bf16.mxu0 %v4400_v57  ;;  %2245 = vmatprep.subr.bf16.mxu1 %v4402_v58  ;;  %v4501_v57 = vld [vmem:[#allocation14 + $0x36c] ss:$16 sps:$4 sm:$0xff]  }
 0x115   : > { %v4502_v58 = vld [vmem:[#allocation12 + $0x124] ss:$24 sps:$4 sm:$0xff]  }
 0x117   : > { %1907 = vmatpush1.bf16.msra.mxu0 %v4404_v59  ;;  %2246 = vmatpush1.bf16.msra.mxu1 %v4405_v60  ;;  %v4496_v59 = vld [vmem:[#allocation14 + $0x360] ss:$16 sps:$4 sm:$0xff]   ;;  %v4499_v60 = vld [vmem:[#allocation14 + $0x368] ss:$16 sps:$4 sm:$0xff]  }
 0x118   : > { %1908 = vmatprep.subr.bf16.mxu0 %v4406_v61  ;;  %2247 = vmatprep.subr.bf16.mxu1 %v4408_v62  ;;  %v4507_v61 = vld [vmem:[#allocation14 + $0x384] ss:$16 sps:$4 sm:$0xff]   ;;  %v4510_v62 = vld [vmem:[#allocation14 + $0x38c] ss:$16 sps:$4 sm:$0xff]  }
 0x11b   : > { %1909 = vmatpush1.bf16.msra.mxu0 %v4410_v63  ;;  %2248 = vmatpush1.bf16.msra.mxu1 %v4411_v0  ;;  %v4504_v63 = vld [vmem:[#allocation12 + $0x120] ss:$24 sps:$4 sm:$0xff]  }
 0x11c   : > { %1991 = vmatprep.subr.bf16.mxu0 %v4417_v1  ;;  %2330 = vmatprep.subr.bf16.mxu1 %v4420_v2  ;;  %v4505_v0 = vld [vmem:[#allocation14 + $0x380] ss:$16 sps:$4 sm:$0xff]   ;;  %v4508_v1 = vld [vmem:[#allocation14 + $0x388] ss:$16 sps:$4 sm:$0xff]   ;;  %v4513_v2 = vld [vmem:[#allocation14 + $0x3a4] ss:$16 sps:$4 sm:$0xff]  }
 0x11e   : > { %1911 = vmatmul.mubr.bf16.vlgmr.msra.gmra.mrb[0].mxu0 %v4412_v3  ;;  %2250 = vmatmul.mubr.bf16.vlgmr.msra.gmra.mrb[0].mxu1 %v4412_v3  ;;  %v4516_v3 = vld [vmem:[#allocation14 + $0x3ac] ss:$16 sps:$4 sm:$0xff]  }
 0x11f   : > { %1992 = vmatpush1.bf16.msra.mxu0 %v4415_v4  ;;  %2331 = vmatpush1.bf16.msra.mxu1 %v4418_v5  ;;  %v4517_v4 = vld [vmem:[#allocation12 + $0x154] ss:$24 sps:$4 sm:$0xff]   ;;  %v4511_v5 = vld [vmem:[#allocation14 + $0x3a0] ss:$16 sps:$4 sm:$0xff]  }
 0x120   : > { %1993 = vmatprep.subr.bf16.mxu0 %v4423_v6  ;;  %2332 = vmatprep.subr.bf16.mxu1 %v4426_v7  ;;  %v4514_v6 = vld [vmem:[#allocation14 + $0x3a8] ss:$16 sps:$4 sm:$0xff]   ;;  %v4522_v7 = vld [vmem:[#allocation14 + $0x3c4] ss:$16 sps:$4 sm:$0xff]  }
 0x121   : > { %1920 = vmatprep.mubr.bf16.mxu0 %v4427_v8  ;;  %2259 = vmatprep.mubr.bf16.mxu1 %v4427_v8  ;;  %v4525_v8 = vld [vmem:[#allocation14 + $0x3cc] ss:$16 sps:$4 sm:$0xff]  }
 0x123   : > { %1994 = vmatpush1.bf16.msra.mxu0 %v4421_v9  ;;  %2333 = vmatpush1.bf16.msra.mxu1 %v4424_v10  ;;  %v4519_v9 = vld [vmem:[#allocation12 + $0x150] ss:$24 sps:$4 sm:$0xff]  }
 0x124   : > { %1995 = vmatprep.subr.bf16.mxu0 %v4432_v11  ;;  %2334 = vmatprep.subr.bf16.mxu1 %v4435_v12  ;;  %v4520_v10 = vld [vmem:[#allocation14 + $0x3c0] ss:$16 sps:$4 sm:$0xff]   ;;  %v4523_v11 = vld [vmem:[#allocation14 + $0x3c8] ss:$16 sps:$4 sm:$0xff]   ;;  %v4528_v12 = vld [vmem:[#allocation14 + $0x3e4] ss:$16 sps:$4 sm:$0xff]  }
 0x126   : > { %1921 = vmatmul.mubr.bf16.gmra.mrb[4].mxu0 %v4429_v13  ;;  %2260 = vmatmul.mubr.bf16.gmra.mrb[4].mxu1 %v4429_v13  ;;  %v4531_v13 = vld [vmem:[#allocation14 + $0x3ec] ss:$16 sps:$4 sm:$0xff]  }
 0x127   : > { %1996 = vmatpush1.bf16.msra.mxu0 %v4430_v14  ;;  %2335 = vmatpush1.bf16.msra.mxu1 %v4433_v15  ;;  %v4534_v14 = vld [vmem:[#allocation12 + $0xc] ss:$24 sps:$4 sm:$0xff]   ;;  %v4526_v15 = vld [vmem:[#allocation14 + $0x3e0] ss:$16 sps:$4 sm:$0xff]  }
 0x128   : > { %1997 = vmatprep.subr.bf16.mxu0 %v4438_v16  ;;  %2336 = vmatprep.subr.bf16.mxu1 %v4441_v17  ;;  %v4529_v16 = vld [vmem:[#allocation14 + $0x3e8] ss:$16 sps:$4 sm:$0xff]   ;;  %v4537_v17 = vld [vmem:[#allocation14 + $0x404] ss:$16 sps:$4 sm:$0xff]  }
 0x129   : > { %1930 = vmatprep.mubr.bf16.mxu0 %v4442_v18  ;;  %2269 = vmatprep.mubr.bf16.mxu1 %v4442_v18  ;;  %v4540_v18 = vld [vmem:[#allocation14 + $0x40c] ss:$16 sps:$4 sm:$0xff]  }
 0x12b   : > { %1998 = vmatpush1.bf16.msra.mxu0 %v4436_v19  ;;  %2337 = vmatpush1.bf16.msra.mxu1 %v4439_v20  ;;  %v4532_v19 = vld [vmem:[#allocation12 + $0x8] ss:$24 sps:$4 sm:$0xff]  }
 0x12c   : > { %1999 = vmatprep.subr.bf16.mxu0 %v4447_v21  ;;  %2338 = vmatprep.subr.bf16.mxu1 %v4450_v22  ;;  %v4535_v20 = vld [vmem:[#allocation14 + $0x400] ss:$16 sps:$4 sm:$0xff]   ;;  %v4538_v21 = vld [vmem:[#allocation14 + $0x408] ss:$16 sps:$4 sm:$0xff]   ;;  %v4543_v22 = vld [vmem:[#allocation14 + $0x424] ss:$16 sps:$4 sm:$0xff]  }
 0x12e   : > { %1931 = vmatmul.mubr.bf16.gmra.mrb[8].mxu0 %v4444_v23  ;;  %2270 = vmatmul.mubr.bf16.gmra.mrb[8].mxu1 %v4444_v23  ;;  %v4546_v23 = vld [vmem:[#allocation14 + $0x42c] ss:$16 sps:$4 sm:$0xff]  }
 0x12f   : > { %2000 = vmatpush1.bf16.msra.mxu0 %v4445_v24  ;;  %2339 = vmatpush1.bf16.msra.mxu1 %v4448_v25  ;;  %v4547_v24 = vld [vmem:[#allocation12 + $0x3c] ss:$24 sps:$4 sm:$0xff]   ;;  %v4541_v25 = vld [vmem:[#allocation14 + $0x420] ss:$16 sps:$4 sm:$0xff]  }
 0x130   : > { %2001 = vmatprep.subr.bf16.mxu0 %v4453_v26  ;;  %2340 = vmatprep.subr.bf16.mxu1 %v4456_v27  ;;  %v4544_v26 = vld [vmem:[#allocation14 + $0x428] ss:$16 sps:$4 sm:$0xff]   ;;  %v4552_v27 = vld [vmem:[#allocation14 + $0x444] ss:$16 sps:$4 sm:$0xff]  }
 0x131   : > { %1940 = vmatprep.mubr.bf16.mxu0 %v4457_v28  ;;  %2279 = vmatprep.mubr.bf16.mxu1 %v4457_v28  ;;  %v4555_v28 = vld [vmem:[#allocation14 + $0x44c] ss:$16 sps:$4 sm:$0xff]  }
 0x133   : > { %2002 = vmatpush1.bf16.msra.mxu0 %v4451_v29  ;;  %2341 = vmatpush1.bf16.msra.mxu1 %v4454_v30  ;;  %v4549_v29 = vld [vmem:[#allocation12 + $0x38] ss:$24 sps:$4 sm:$0xff]  }
 0x134   : > { %2003 = vmatprep.subr.bf16.mxu0 %v4462_v31  ;;  %2342 = vmatprep.subr.bf16.mxu1 %v4465_v32  ;;  %v4550_v30 = vld [vmem:[#allocation14 + $0x440] ss:$16 sps:$4 sm:$0xff]   ;;  %v4553_v31 = vld [vmem:[#allocation14 + $0x448] ss:$16 sps:$4 sm:$0xff]   ;;  %v4558_v32 = vld [vmem:[#allocation14 + $0x464] ss:$16 sps:$4 sm:$0xff]  }
 0x136   : > { %1941 = vmatmul.mubr.bf16.gmra.mrb[12].mxu0 %v4459_v33  ;;  %2280 = vmatmul.mubr.bf16.gmra.mrb[12].mxu1 %v4459_v33  ;;  %v4561_v33 = vld [vmem:[#allocation14 + $0x46c] ss:$16 sps:$4 sm:$0xff]  }
 0x137   : > { %2004 = vmatpush1.bf16.msra.mxu0 %v4460_v34  ;;  %2343 = vmatpush1.bf16.msra.mxu1 %v4463_v35  ;;  %v4562_v34 = vld [vmem:[#allocation12 + $0x6c] ss:$24 sps:$4 sm:$0xff]   ;;  %v4556_v35 = vld [vmem:[#allocation14 + $0x460] ss:$16 sps:$4 sm:$0xff]  }
 0x138   : > { %2005 = vmatprep.subr.bf16.mxu0 %v4468_v36  ;;  %2344 = vmatprep.subr.bf16.mxu1 %v4471_v37  ;;  %v4559_v36 = vld [vmem:[#allocation14 + $0x468] ss:$16 sps:$4 sm:$0xff]   ;;  %v4567_v37 = vld [vmem:[#allocation14 + $0x484] ss:$16 sps:$4 sm:$0xff]  }
 0x139   : > { %1950 = vmatprep.mubr.bf16.mxu0 %v4472_v38  ;;  %2289 = vmatprep.mubr.bf16.mxu1 %v4472_v38  ;;  %v4570_v38 = vld [vmem:[#allocation14 + $0x48c] ss:$16 sps:$4 sm:$0xff]  }
 0x13b   : > { %2006 = vmatpush1.bf16.msra.mxu0 %v4466_v39  ;;  %2345 = vmatpush1.bf16.msra.mxu1 %v4469_v40  ;;  %v4564_v39 = vld [vmem:[#allocation12 + $0x68] ss:$24 sps:$4 sm:$0xff]  }
 0x13c   : > { %2007 = vmatprep.subr.bf16.mxu0 %v4477_v41  ;;  %2346 = vmatprep.subr.bf16.mxu1 %v4480_v42  ;;  %v4565_v40 = vld [vmem:[#allocation14 + $0x480] ss:$16 sps:$4 sm:$0xff]   ;;  %v4568_v41 = vld [vmem:[#allocation14 + $0x488] ss:$16 sps:$4 sm:$0xff]   ;;  %v4573_v42 = vld [vmem:[#allocation14 + $0x4a4] ss:$16 sps:$4 sm:$0xff]  }
 0x13e   : > { %1951 = vmatmul.mubr.bf16.gmra.mrb[16].mxu0 %v4474_v43  ;;  %2290 = vmatmul.mubr.bf16.gmra.mrb[16].mxu1 %v4474_v43  ;;  %v4576_v43 = vld [vmem:[#allocation14 + $0x4ac] ss:$16 sps:$4 sm:$0xff]  }
 0x13f   : > { %2008 = vmatpush1.bf16.msra.mxu0 %v4475_v44  ;;  %2347 = vmatpush1.bf16.msra.mxu1 %v4478_v45  ;;  %v4577_v44 = vld [vmem:[#allocation12 + $0x9c] ss:$24 sps:$4 sm:$0xff]   ;;  %v4571_v45 = vld [vmem:[#allocation14 + $0x4a0] ss:$16 sps:$4 sm:$0xff]  }
 0x140   : > { %2009 = vmatprep.subr.bf16.mxu0 %v4483_v46  ;;  %2348 = vmatprep.subr.bf16.mxu1 %v4486_v47  ;;  %v4574_v46 = vld [vmem:[#allocation14 + $0x4a8] ss:$16 sps:$4 sm:$0xff]   ;;  %v4582_v47 = vld [vmem:[#allocation14 + $0x4c4] ss:$16 sps:$4 sm:$0xff]  }
 0x141   : > { %1960 = vmatprep.mubr.bf16.mxu0 %v4487_v48  ;;  %2299 = vmatprep.mubr.bf16.mxu1 %v4487_v48  ;;  %v4585_v48 = vld [vmem:[#allocation14 + $0x4cc] ss:$16 sps:$4 sm:$0xff]  }
 0x143   : > { %2010 = vmatpush1.bf16.msra.mxu0 %v4481_v49  ;;  %2349 = vmatpush1.bf16.msra.mxu1 %v4484_v50  ;;  %v4579_v49 = vld [vmem:[#allocation12 + $0x98] ss:$24 sps:$4 sm:$0xff]  }
 0x144   : > { %2011 = vmatprep.subr.bf16.mxu0 %v4492_v51  ;;  %2350 = vmatprep.subr.bf16.mxu1 %v4495_v52  ;;  %v4580_v50 = vld [vmem:[#allocation14 + $0x4c0] ss:$16 sps:$4 sm:$0xff]   ;;  %v4583_v51 = vld [vmem:[#allocation14 + $0x4c8] ss:$16 sps:$4 sm:$0xff]   ;;  %v388_v52 = vlaneseq }
 0x146   : > { %1961 = vmatmul.mubr.bf16.gmra.mrb[20].mxu0 %v4489_v53  ;;  %2300 = vmatmul.mubr.bf16.gmra.mrb[20].mxu1 %v4489_v53  ;;  %v4588_v53 = vld [vmem:[#allocation14 + $0x4e4] ss:$16 sps:$4 sm:$0xff]  }
 0x147   : > { %2012 = vmatpush1.bf16.msra.mxu0 %v4490_v54  ;;  %2351 = vmatpush1.bf16.msra.mxu1 %v4493_v55  ;;  %v4591_v54 = vld [vmem:[#allocation14 + $0x4ec] ss:$16 sps:$4 sm:$0xff]  }
 0x148   : > { %2013 = vmatprep.subr.bf16.mxu0 %v4498_v56  ;;  %2352 = vmatprep.subr.bf16.mxu1 %v4501_v57  ;;  %v4592_v55 = vld [vmem:[#allocation12 + $0xcc] ss:$24 sps:$4 sm:$0xff]   ;;  %v4586_v56 = vld [vmem:[#allocation14 + $0x4e0] ss:$16 sps:$4 sm:$0xff]   ;;  %v4589_v57 = vld [vmem:[#allocation14 + $0x4e8] ss:$16 sps:$4 sm:$0xff]  }
 0x149   : > { %1970 = vmatprep.mubr.bf16.mxu0 %v4502_v58  ;;  %2309 = vmatprep.mubr.bf16.mxu1 %v4502_v58  ;;  %v5411_v58 = vshrl.u32 %v388_v52, 7  ;;  %v4675_v52 = vld [vmem:[#allocation12 + $0x160] ss:$24 sps:$4 sm:$0xff]  }
 0x14b   : > { %2014 = vmatpush1.bf16.msra.mxu0 %v4496_v59  ;;  %2353 = vmatpush1.bf16.msra.mxu1 %v4499_v60  ;;  %v4597_v59 = vld [vmem:[#allocation14 + $0x504] ss:$16 sps:$4 sm:$0xff]   ;;  %v4600_v60 = vld [vmem:[#allocation14 + $0x50c] ss:$16 sps:$4 sm:$0xff]  }
 0x14c   : > { %2015 = vmatprep.subr.bf16.mxu0 %v4507_v61  ;;  %2354 = vmatprep.subr.bf16.mxu1 %v4510_v62  ;;  %v4594_v61 = vld [vmem:[#allocation12 + $0xc8] ss:$24 sps:$4 sm:$0xff]   ;;  %v390_v62 = vsub.s32 0, %v5411_v58 }
 0x14e   : > { %1971 = vmatmul.mubr.bf16.gmra.mrb[24].mxu0 %v4504_v63  ;;  %2310 = vmatmul.mubr.bf16.gmra.mrb[24].mxu1 %v4504_v63  ;;  %v4595_v63 = vld [vmem:[#allocation14 + $0x500] ss:$16 sps:$4 sm:$0xff]  }
 0x14f   : > { %2016 = vmatpush1.bf16.msra.mxu0 %v4505_v0  ;;  %2355 = vmatpush1.bf16.msra.mxu1 %v4508_v1  ;;  %v4598_v0 = vld [vmem:[#allocation14 + $0x508] ss:$16 sps:$4 sm:$0xff]   ;;  %v5414_v1 = vld [vmem:[#allocation11] sm:$0xf] }
 0x150   : > { %2017 = vmatprep.subr.bf16.mxu0 %v4513_v2  ;;  %2356 = vmatprep.subr.bf16.mxu1 %v4516_v3  ;;  %v4603_v2 = vld [vmem:[#allocation14 + $0x524] ss:$16 sps:$4 sm:$0xff]   ;;  %v4606_v3 = vld [vmem:[#allocation14 + $0x52c] ss:$16 sps:$4 sm:$0xff]  }
 0x151   : > { %1980 = vmatprep.mubr.bf16.mxu0 %v4517_v4  ;;  %2319 = vmatprep.mubr.bf16.mxu1 %v4517_v4  ;;  %v391_v4 = vrot.slane %v5414_v1, %v390_v62 }
 0x153   : > { %2018 = vmatpush1.bf16.msra.mxu0 %v4511_v5  ;;  %2357 = vmatpush1.bf16.msra.mxu1 %v4514_v6  ;;  %v4607_v5 = vld [vmem:[#allocation12 + $0xfc] ss:$24 sps:$4 sm:$0xff]   ;;  %408 = vst [vmem:[#allocation2] sm:$0xff] %v391_v4  ;;  %412 = vst [vmem:[#allocation2 + $0x20] sm:$0xff] %v391_v4  ;;  %v4601_v6 = vld [vmem:[#allocation14 + $0x520] ss:$16 sps:$4 sm:$0xff]  }
 0x154   : > { %2019 = vmatprep.subr.bf16.mxu0 %v4522_v7  ;;  %2358 = vmatprep.subr.bf16.mxu1 %v4525_v8  ;;  %v4604_v7 = vld [vmem:[#allocation14 + $0x528] ss:$16 sps:$4 sm:$0xff]   ;;  %v4612_v8 = vld [vmem:[#allocation14 + $0x544] ss:$16 sps:$4 sm:$0xff]  }
 0x156   : > { %1981 = vmatmul.mubr.bf16.gmra.mrb[28].mxu0 %v4519_v9  ;;  %2320 = vmatmul.mubr.bf16.gmra.mrb[28].mxu1 %v4519_v9  ;;  %v4615_v9 = vld [vmem:[#allocation14 + $0x54c] ss:$16 sps:$4 sm:$0xff]  }
 0x157   : > { %2020 = vmatpush1.bf16.msra.mxu0 %v4520_v10  ;;  %2359 = vmatpush1.bf16.msra.mxu1 %v4523_v11  ;;  %v4609_v10 = vld [vmem:[#allocation12 + $0xf8] ss:$24 sps:$4 sm:$0xff]  }
 0x158   : > { %2021 = vmatprep.subr.bf16.mxu0 %v4528_v12  ;;  %2360 = vmatprep.subr.bf16.mxu1 %v4531_v13  ;;  %v4610_v11 = vld [vmem:[#allocation14 + $0x540] ss:$16 sps:$4 sm:$0xff]   ;;  %v4613_v12 = vld [vmem:[#allocation14 + $0x548] ss:$16 sps:$4 sm:$0xff]   ;;  %v4618_v13 = vld [vmem:[#allocation14 + $0x564] ss:$16 sps:$4 sm:$0xff]  }
 0x159   : > { %2023 = vmatprep.mubr.bf16.mxu0 %v4534_v14  ;;  %2362 = vmatprep.mubr.bf16.mxu1 %v4534_v14  ;;  %v4621_v14 = vld [vmem:[#allocation14 + $0x56c] ss:$16 sps:$4 sm:$0xff]  }
 0x15b   : > { %2022 = vmatpush1.bf16.msra.mxu0 %v4526_v15  ;;  %2361 = vmatpush1.bf16.msra.mxu1 %v4529_v16  ;;  %v4622_v15 = vld [vmem:[#allocation12 + $0x12c] ss:$24 sps:$4 sm:$0xff]   ;;  %v4616_v16 = vld [vmem:[#allocation14 + $0x560] ss:$16 sps:$4 sm:$0xff]  }
 0x15c   : > { %2104 = vmatprep.subr.bf16.mxu0 %v4537_v17  ;;  %2443 = vmatprep.subr.bf16.mxu1 %v4540_v18  ;;  %v4619_v17 = vld [vmem:[#allocation14 + $0x568] ss:$16 sps:$4 sm:$0xff]   ;;  %v4627_v18 = vld [vmem:[#allocation14 + $0x584] ss:$16 sps:$4 sm:$0xff]  }
 0x15e   : > { %2024 = vmatmul.mubr.bf16.vlgmr.msra.gmra.mrb[0].mxu0 %v4532_v19  ;;  %2363 = vmatmul.mubr.bf16.vlgmr.msra.gmra.mrb[0].mxu1 %v4532_v19  ;;  %v4630_v19 = vld [vmem:[#allocation14 + $0x58c] ss:$16 sps:$4 sm:$0xff]  }
 0x15f   : > { %2105 = vmatpush1.bf16.msra.mxu0 %v4535_v20  ;;  %2444 = vmatpush1.bf16.msra.mxu1 %v4538_v21  ;;  %v4624_v20 = vld [vmem:[#allocation12 + $0x128] ss:$24 sps:$4 sm:$0xff]  }
 0x160   : > { %2106 = vmatprep.subr.bf16.mxu0 %v4543_v22  ;;  %2445 = vmatprep.subr.bf16.mxu1 %v4546_v23  ;;  %v4625_v21 = vld [vmem:[#allocation14 + $0x580] ss:$16 sps:$4 sm:$0xff]   ;;  %v4628_v22 = vld [vmem:[#allocation14 + $0x588] ss:$16 sps:$4 sm:$0xff]   ;;  %v4633_v23 = vld [vmem:[#allocation14 + $0x5a4] ss:$16 sps:$4 sm:$0xff]  }
 0x161   : > { %2033 = vmatprep.mubr.bf16.mxu0 %v4547_v24  ;;  %2372 = vmatprep.mubr.bf16.mxu1 %v4547_v24  ;;  %v4636_v24 = vld [vmem:[#allocation14 + $0x5ac] ss:$16 sps:$4 sm:$0xff]  }
 0x163   : > { %2107 = vmatpush1.bf16.msra.mxu0 %v4541_v25  ;;  %2446 = vmatpush1.bf16.msra.mxu1 %v4544_v26  ;;  %v4637_v25 = vld [vmem:[#allocation12 + $0x15c] ss:$24 sps:$4 sm:$0xff]   ;;  %v4631_v26 = vld [vmem:[#allocation14 + $0x5a0] ss:$16 sps:$4 sm:$0xff]  }
 0x164   : > { %2108 = vmatprep.subr.bf16.mxu0 %v4552_v27  ;;  %2447 = vmatprep.subr.bf16.mxu1 %v4555_v28  ;;  %v4634_v27 = vld [vmem:[#allocation14 + $0x5a8] ss:$16 sps:$4 sm:$0xff]   ;;  %v4642_v28 = vld [vmem:[#allocation14 + $0x5c4] ss:$16 sps:$4 sm:$0xff]  }
 0x166   : > { %2034 = vmatmul.mubr.bf16.gmra.mrb[4].mxu0 %v4549_v29  ;;  %2373 = vmatmul.mubr.bf16.gmra.mrb[4].mxu1 %v4549_v29  ;;  %v4645_v29 = vld [vmem:[#allocation14 + $0x5cc] ss:$16 sps:$4 sm:$0xff]  }
 0x167   : > { %2109 = vmatpush1.bf16.msra.mxu0 %v4550_v30  ;;  %2448 = vmatpush1.bf16.msra.mxu1 %v4553_v31  ;;  %v4639_v30 = vld [vmem:[#allocation12 + $0x158] ss:$24 sps:$4 sm:$0xff]  }
 0x168   : > { %2110 = vmatprep.subr.bf16.mxu0 %v4558_v32  ;;  %2449 = vmatprep.subr.bf16.mxu1 %v4561_v33  ;;  %v4640_v31 = vld [vmem:[#allocation14 + $0x5c0] ss:$16 sps:$4 sm:$0xff]   ;;  %v4643_v32 = vld [vmem:[#allocation14 + $0x5c8] ss:$16 sps:$4 sm:$0xff]   ;;  %v4648_v33 = vld [vmem:[#allocation14 + $0x5e4] ss:$16 sps:$4 sm:$0xff]  }
 0x169   : > { %2043 = vmatprep.mubr.bf16.mxu0 %v4562_v34  ;;  %2382 = vmatprep.mubr.bf16.mxu1 %v4562_v34  ;;  %v4651_v34 = vld [vmem:[#allocation14 + $0x5ec] ss:$16 sps:$4 sm:$0xff]  }
 0x16b   : > { %2111 = vmatpush1.bf16.msra.mxu0 %v4556_v35  ;;  %2450 = vmatpush1.bf16.msra.mxu1 %v4559_v36  ;;  %v4654_v35 = vld [vmem:[#allocation12 + $0x14] ss:$24 sps:$4 sm:$0xff]   ;;  %v4646_v36 = vld [vmem:[#allocation14 + $0x5e0] ss:$16 sps:$4 sm:$0xff]  }
 0x16c   : > { %2112 = vmatprep.subr.bf16.mxu0 %v4567_v37  ;;  %2451 = vmatprep.subr.bf16.mxu1 %v4570_v38  ;;  %v4649_v37 = vld [vmem:[#allocation14 + $0x5e8] ss:$16 sps:$4 sm:$0xff]  }
 0x16d   : > { %v4652_v38 = vld [vmem:[#allocation12 + $0x10] ss:$24 sps:$4 sm:$0xff]  }
 0x16e   : > { %2044 = vmatmul.mubr.bf16.gmra.mrb[8].mxu0 %v4564_v39  ;;  %2383 = vmatmul.mubr.bf16.gmra.mrb[8].mxu1 %v4564_v39  ;;  %v4655_v39 = vld [vmem:[#allocation12 + $0x44] ss:$24 sps:$4 sm:$0xff]  }
 0x16f   : > { %2113 = vmatpush1.bf16.msra.mxu0 %v4565_v40  ;;  %2452 = vmatpush1.bf16.msra.mxu1 %v4568_v41  ;;  %v4657_v40 = vld [vmem:[#allocation12 + $0x40] ss:$24 sps:$4 sm:$0xff]   ;;  %v4658_v41 = vld [vmem:[#allocation12 + $0x74] ss:$24 sps:$4 sm:$0xff]  }
 0x170   : > { %2114 = vmatprep.subr.bf16.mxu0 %v4573_v42  ;;  %2453 = vmatprep.subr.bf16.mxu1 %v4576_v43  ;;  %v4660_v42 = vld [vmem:[#allocation12 + $0x70] ss:$24 sps:$4 sm:$0xff]   ;;  %v4661_v43 = vld [vmem:[#allocation12 + $0xa4] ss:$24 sps:$4 sm:$0xff]  }
 0x171   : > { %2053 = vmatprep.mubr.bf16.mxu0 %v4577_v44  ;;  %2392 = vmatprep.mubr.bf16.mxu1 %v4577_v44  ;;  %v4663_v44 = vld [vmem:[#allocation12 + $0xa0] ss:$24 sps:$4 sm:$0xff]  }
 0x173   : > { %2115 = vmatpush1.bf16.msra.mxu0 %v4571_v45  ;;  %2454 = vmatpush1.bf16.msra.mxu1 %v4574_v46  ;;  %v4664_v45 = vld [vmem:[#allocation12 + $0xd4] ss:$24 sps:$4 sm:$0xff]   ;;  %v4666_v46 = vld [vmem:[#allocation12 + $0xd0] ss:$24 sps:$4 sm:$0xff]  }
 0x174   : > { %2116 = vmatprep.subr.bf16.mxu0 %v4582_v47  ;;  %2455 = vmatprep.subr.bf16.mxu1 %v4585_v48  ;;  %v4667_v47 = vld [vmem:[#allocation12 + $0x104] ss:$24 sps:$4 sm:$0xff]   ;;  %v4669_v48 = vld [vmem:[#allocation12 + $0x100] ss:$24 sps:$4 sm:$0xff]  }
 0x176   : > { %2054 = vmatmul.mubr.bf16.gmra.mrb[12].mxu0 %v4579_v49  ;;  %2393 = vmatmul.mubr.bf16.gmra.mrb[12].mxu1 %v4579_v49  ;;  %v4670_v49 = vld [vmem:[#allocation12 + $0x134] ss:$24 sps:$4 sm:$0xff]  }
 0x177   : > { %2117 = vmatpush1.bf16.msra.mxu0 %v4580_v50  ;;  %2456 = vmatpush1.bf16.msra.mxu1 %v4583_v51  ;;  %v4672_v50 = vld [vmem:[#allocation12 + $0x130] ss:$24 sps:$4 sm:$0xff]   ;;  %v4673_v51 = vld [vmem:[#allocation12 + $0x164] ss:$24 sps:$4 sm:$0xff]  }
 0x178   : > { %2118 = vmatprep.subr.bf16.mxu0 %v4588_v53  ;;  %2457 = vmatprep.subr.bf16.mxu1 %v4591_v54  ;;  %v398_v53 = vsub.s32 2, %v5411_v58  ;;  %v394_v54 = vsub.s32 1, %v5411_v58 }
 0x179   : > { %2063 = vmatprep.mubr.bf16.mxu0 %v4592_v55  ;;  %2402 = vmatprep.mubr.bf16.mxu1 %v4592_v55  ;;  %v402_v55 = vsub.s32 3, %v5411_v58 }
 0x17b   : > { %2119 = vmatpush1.bf16.msra.mxu0 %v4586_v56  ;;  %2458 = vmatpush1.bf16.msra.mxu1 %v4589_v57  ;;  %v399_v56 = vrot.slane %v5414_v1, %v398_v53  ;;  %v395_v57 = vrot.slane %v5414_v1, %v394_v54 }
 0x17c   : > { %2120 = vmatprep.subr.bf16.mxu0 %v4597_v59  ;;  %2459 = vmatprep.subr.bf16.mxu1 %v4600_v60  ;;  %v403_v59 = vrot.slane %v5414_v1, %v402_v55  ;;  %v656_v60 = vld [vmem:[#allocation15] sm:$0xf] }
 0x17d   : > { %410 = vst [vmem:[#allocation2 + $0x10] sm:$0xff] %v399_v56  ;;  %414 = vst [vmem:[#allocation2 + $0x30] sm:$0xff] %v399_v56 }
 0x17e   : > { %2064 = vmatmul.mubr.bf16.gmra.mrb[16].mxu0 %v4594_v61  ;;  %2403 = vmatmul.mubr.bf16.gmra.mrb[16].mxu1 %v4594_v61  ;;  %409 = vst [vmem:[#allocation2 + $0x8] sm:$0xff] %v395_v57  ;;  %413 = vst [vmem:[#allocation2 + $0x28] sm:$0xff] %v395_v57  ;;  %v5427_v61 = vrot.slane %v656_v60, %v390_v62 }
 0x17f   : > { %2121 = vmatpush1.bf16.msra.mxu0 %v4595_v63  ;;  %2460 = vmatpush1.bf16.msra.mxu1 %v4598_v0  ;;  %411 = vst [vmem:[#allocation2 + $0x18] sm:$0xff] %v403_v59  ;;  %415 = vst [vmem:[#allocation2 + $0x38] sm:$0xff] %v403_v59  ;;  %v5429_v63 = vrot.slane %v656_v60, %v398_v53  ;;  %v5431_v0 = vrot.slane %v656_v60, %v394_v54 }
 0x180   : > { %2122 = vmatprep.subr.bf16.mxu0 %v4603_v2  ;;  %2461 = vmatprep.subr.bf16.mxu1 %v4606_v3  ;;  %v5433_v2 = vrot.slane %v656_v60, %v402_v55 }
 0x181   : > { %2073 = vmatprep.mubr.bf16.mxu0 %v4607_v5  ;;  %2412 = vmatprep.mubr.bf16.mxu1 %v4607_v5 }
 0x183   : > { %2123 = vmatpush1.bf16.msra.mxu0 %v4601_v6  ;;  %2462 = vmatpush1.bf16.msra.mxu1 %v4604_v7 }
 0x184   : > { %2124 = vmatprep.subr.bf16.mxu0 %v4612_v8  ;;  %2463 = vmatprep.subr.bf16.mxu1 %v4615_v9 }
 0x186   : > { %2074 = vmatmul.mubr.bf16.gmra.mrb[20].mxu0 %v4609_v10  ;;  %2413 = vmatmul.mubr.bf16.gmra.mrb[20].mxu1 %v4609_v10 }
 0x187   : > { %2125 = vmatpush1.bf16.msra.mxu0 %v4610_v11  ;;  %2464 = vmatpush1.bf16.msra.mxu1 %v4613_v12 }
 0x188   : > { %2126 = vmatprep.subr.bf16.mxu0 %v4618_v13  ;;  %2465 = vmatprep.subr.bf16.mxu1 %v4621_v14 }
 0x189   : > { %2083 = vmatprep.mubr.bf16.mxu0 %v4622_v15  ;;  %2422 = vmatprep.mubr.bf16.mxu1 %v4622_v15 }
 0x18b   : > { %2127 = vmatpush1.bf16.msra.mxu0 %v4616_v16  ;;  %2466 = vmatpush1.bf16.msra.mxu1 %v4619_v17 }
 0x18c   : > { %2128 = vmatprep.subr.bf16.mxu0 %v4627_v18  ;;  %2467 = vmatprep.subr.bf16.mxu1 %v4630_v19 }
 0x18e   : > { %2084 = vmatmul.mubr.bf16.gmra.mrb[24].mxu0 %v4624_v20  ;;  %2423 = vmatmul.mubr.bf16.gmra.mrb[24].mxu1 %v4624_v20 }
 0x18f   : > { %2129 = vmatpush1.bf16.msra.mxu0 %v4625_v21  ;;  %2468 = vmatpush1.bf16.msra.mxu1 %v4628_v22 }
 0x190   : > { %2130 = vmatprep.subr.bf16.mxu0 %v4633_v23  ;;  %2469 = vmatprep.subr.bf16.mxu1 %v4636_v24 }
 0x191   : > { %2093 = vmatprep.mubr.bf16.mxu0 %v4637_v25  ;;  %2432 = vmatprep.mubr.bf16.mxu1 %v4637_v25 }
 0x193   : > { %2131 = vmatpush1.bf16.msra.mxu0 %v4631_v26  ;;  %2470 = vmatpush1.bf16.msra.mxu1 %v4634_v27 }
 0x194   : > { %2132 = vmatprep.subr.bf16.mxu0 %v4642_v28  ;;  %2471 = vmatprep.subr.bf16.mxu1 %v4645_v29 }
 0x196   : > { %2094 = vmatmul.mubr.bf16.gmra.mrb[28].mxu0 %v4639_v30  ;;  %2433 = vmatmul.mubr.bf16.gmra.mrb[28].mxu1 %v4639_v30 }
 0x197   : > { %2133 = vmatpush1.bf16.msra.mxu0 %v4640_v31  ;;  %2472 = vmatpush1.bf16.msra.mxu1 %v4643_v32 }
 0x198   : > { %2134 = vmatprep.subr.bf16.mxu0 %v4648_v33  ;;  %2473 = vmatprep.subr.bf16.mxu1 %v4651_v34 }
 0x199   : > { %2136 = vmatprep.mubr.bf16.mxu0 %v4654_v35  ;;  %2475 = vmatprep.mubr.bf16.mxu1 %v4654_v35 }
 0x19b   : > { %2135 = vmatpush1.bf16.msra.mxu0 %v4646_v36  ;;  %2474 = vmatpush1.bf16.msra.mxu1 %v4649_v37 }
 0x19e   : > { %2137 = vmatmul.mubr.bf16.vlgmr.msra.gmra.mrb[0].mxu0 %v4652_v38  ;;  %2476 = vmatmul.mubr.bf16.vlgmr.msra.gmra.mrb[0].mxu1 %v4652_v38 }
 0x19f   : > { %2146 = vmatprep.mubr.bf16.mxu0 %v4655_v39  ;;  %2485 = vmatprep.mubr.bf16.mxu1 %v4655_v39 }
 0x1a6   : > { %2147 = vmatmul.mubr.bf16.gmra.mrb[4].mxu0 %v4657_v40  ;;  %2486 = vmatmul.mubr.bf16.gmra.mrb[4].mxu1 %v4657_v40 }
 0x1a7   : > { %2156 = vmatprep.mubr.bf16.mxu0 %v4658_v41  ;;  %2495 = vmatprep.mubr.bf16.mxu1 %v4658_v41 }
 0x1ae   : > { %2157 = vmatmul.mubr.bf16.gmra.mrb[8].mxu0 %v4660_v42  ;;  %2496 = vmatmul.mubr.bf16.gmra.mrb[8].mxu1 %v4660_v42 }
 0x1af   : > { %2166 = vmatprep.mubr.bf16.mxu0 %v4661_v43  ;;  %2505 = vmatprep.mubr.bf16.mxu1 %v4661_v43 }
 0x1b6   : > { %2167 = vmatmul.mubr.bf16.gmra.mrb[12].mxu0 %v4663_v44  ;;  %2506 = vmatmul.mubr.bf16.gmra.mrb[12].mxu1 %v4663_v44 }
 0x1b7   : > { %2176 = vmatprep.mubr.bf16.mxu0 %v4664_v45  ;;  %2515 = vmatprep.mubr.bf16.mxu1 %v4664_v45 }
 0x1be   : > { %2177 = vmatmul.mubr.bf16.gmra.mrb[16].mxu0 %v4666_v46  ;;  %2516 = vmatmul.mubr.bf16.gmra.mrb[16].mxu1 %v4666_v46 }
 0x1bf   : > { %2186 = vmatprep.mubr.bf16.mxu0 %v4667_v47  ;;  %2525 = vmatprep.mubr.bf16.mxu1 %v4667_v47 }
 0x1c6   : > { %2187 = vmatmul.mubr.bf16.gmra.mrb[20].mxu0 %v4669_v48  ;;  %2526 = vmatmul.mubr.bf16.gmra.mrb[20].mxu1 %v4669_v48 }
 0x1c7   : > { %2196 = vmatprep.mubr.bf16.mxu0 %v4670_v49  ;;  %2535 = vmatprep.mubr.bf16.mxu1 %v4670_v49 }
 0x1ce   : > { %2197 = vmatmul.mubr.bf16.gmra.mrb[24].mxu0 %v4672_v50  ;;  %2536 = vmatmul.mubr.bf16.gmra.mrb[24].mxu1 %v4672_v50 }
 0x1cf   : > { %2206 = vmatprep.mubr.bf16.mxu0 %v4673_v51  ;;  %2545 = vmatprep.mubr.bf16.mxu1 %v4673_v51 }
 0x1d6   : > { %2207 = vmatmul.mubr.bf16.gmra.mrb[28].mxu0 %v4675_v52  ;;  %2546 = vmatmul.mubr.bf16.gmra.mrb[28].mxu1 %v4675_v52 }
 0x271   : > { %v2138_v3 = vpop.f32.mrb[0].mxu0  ;;  %v2477_v4 = vpop.f32.mrb[0].mxu1 }
 0x272   : > { %v5436_v1 = vadd.f32 %v2138_v3, %v5427_v61  ;;  %v5439_v5 = vadd.f32 %v2477_v4, %v5429_v63  ;;  %v2140_v6 = vpop.f32.mrb[1].mxu0  ;;  %v2479_v7 = vpop.f32.mrb[1].mxu1 }
 0x273   : > { %v5442_v58 = vadd.f32 %v2140_v6, %v5431_v0  ;;  %v5445_v62 = vadd.f32 %v2479_v7, %v5433_v2  ;;  %v2142_v8 = vpop.f32.mrb[2].mxu0  ;;  %v2481_v9 = vpop.f32.mrb[2].mxu1 }
 0x274   : > { %v2556_v10 = vmul.f32 %v5436_v1, %v5436_v1  ;;  %v5450_v11 = vadd.f32 %v2142_v8, %v5427_v61  ;;  %v5453_v12 = vadd.f32 %v2481_v9, %v5429_v63  ;;  %v2144_v13 = vpop.f32.mrb[3].mxu0  ;;  %v2483_v14 = vpop.f32.mrb[3].mxu1  ;;  %v2558_v19 = vmul.f32 %v5439_v5, %v5439_v5 }
 0x275   : > { %v2557_v15 = vmul.f32 %v5442_v58, %v5442_v58  ;;  %v5458_v16 = vadd.f32 %v2144_v13, %v5431_v0  ;;  %v5461_v17 = vadd.f32 %v2483_v14, %v5433_v2  ;;  %v2559_v26 = vmul.f32 %v5445_v62, %v5445_v62 }
 0x276   : > { %v2560_v18 = vmul.f32 %v5450_v11, %v5450_v11  ;;  %v2562_v22 = vmul.f32 %v5453_v12, %v5453_v12 }
 0x277   : > { %v2561_v20 = vmul.f32 %v5458_v16, %v5458_v16  ;;  %v2620_v21 = vadd.f32 %v2557_v15, %v2556_v10  ;;  %v2563_v43 = vmul.f32 %v5461_v17, %v5461_v17 }
 0x279   : > { %v2625_v23 = vadd.f32 %v2561_v20, %v2560_v18  ;;  %v2148_v24 = vpop.f32.mrb[4].mxu0  ;;  %v2487_v25 = vpop.f32.mrb[4].mxu1  ;;  %v2621_v27 = vadd.f32 %v2620_v21, %v2558_v19 }
 0x27a   : > { %v5474_v28 = vadd.f32 %v2148_v24, %v5427_v61  ;;  %v5477_v29 = vadd.f32 %v2487_v25, %v5429_v63  ;;  %v2150_v30 = vpop.f32.mrb[5].mxu0  ;;  %v2489_v31 = vpop.f32.mrb[5].mxu1 }
 0x27b   : > { %v5480_v32 = vadd.f32 %v2150_v30, %v5431_v0  ;;  %v5483_v33 = vadd.f32 %v2489_v31, %v5433_v2  ;;  %v2152_v34 = vpop.f32.mrb[6].mxu0  ;;  %v2491_v35 = vpop.f32.mrb[6].mxu1  ;;  %v2622_v36 = vadd.f32 %v2621_v27, %v2559_v26  ;;  %v2626_v37 = vadd.f32 %v2625_v23, %v2562_v22 }
 0x27c   : > { %v2564_v38 = vmul.f32 %v5474_v28, %v5474_v28  ;;  %v5488_v39 = vadd.f32 %v2152_v34, %v5427_v61  ;;  %v5491_v40 = vadd.f32 %v2491_v35, %v5429_v63  ;;  %v2154_v41 = vpop.f32.mrb[7].mxu0  ;;  %v2493_v42 = vpop.f32.mrb[7].mxu1  ;;  %v2566_v48 = vmul.f32 %v5477_v29, %v5477_v29 }
 0x27d   : > { %v2565_v44 = vmul.f32 %v5480_v32, %v5480_v32  ;;  %v5498_v45 = vadd.f32 %v2154_v41, %v5431_v0  ;;  %v5501_v46 = vadd.f32 %v2493_v42, %v5433_v2  ;;  %2623 = vadd.xlane.f32.xlu0 %v2622_v36  ;;  %v2627_v50 = vadd.f32 %v2626_v37, %v2563_v43 }
 0x27e   : > { %v2568_v47 = vmul.f32 %v5488_v39, %v5488_v39  ;;  %v2570_v52 = vmul.f32 %v5491_v40, %v5491_v40  ;;  %v2567_v56 = vmul.f32 %v5483_v33, %v5483_v33 }
 0x27f   : > { %v2569_v49 = vmul.f32 %v5498_v45, %v5498_v45  ;;  %v2630_v51 = vadd.f32 %v2565_v44, %v2564_v38  ;;  %v2571_v21 = vmul.f32 %v5501_v46, %v5501_v46 }
 0x281   : > { %v2635_v53 = vadd.f32 %v2569_v49, %v2568_v47  ;;  %v2158_v54 = vpop.f32.mrb[8].mxu0  ;;  %v2497_v55 = vpop.f32.mrb[8].mxu1  ;;  %2628 = vadd.xlane.f32.xlu0 %v2627_v50  ;;  %v2631_v57 = vadd.f32 %v2630_v51, %v2566_v48 }
 0x282   : > { %v5514_v59 = vadd.f32 %v2158_v54, %v5427_v61  ;;  %v5517_v60 = vadd.f32 %v2497_v55, %v5429_v63  ;;  %v2160_v3 = vpop.f32.mrb[9].mxu0  ;;  %v2499_v4 = vpop.f32.mrb[9].mxu1 }
 0x283   : > { %v5520_v6 = vadd.f32 %v2160_v3, %v5431_v0  ;;  %v5523_v7 = vadd.f32 %v2499_v4, %v5433_v2  ;;  %v2162_v8 = vpop.f32.mrb[10].mxu0  ;;  %v2501_v9 = vpop.f32.mrb[10].mxu1  ;;  %v2632_v10 = vadd.f32 %v2631_v57, %v2567_v56  ;;  %v2636_v13 = vadd.f32 %v2635_v53, %v2570_v52 }
 0x284   : > { %v2572_v14 = vmul.f32 %v5514_v59, %v5514_v59  ;;  %v5528_v15 = vadd.f32 %v2162_v8, %v5427_v61  ;;  %v5531_v18 = vadd.f32 %v2501_v9, %v5429_v63  ;;  %v2164_v19 = vpop.f32.mrb[11].mxu0  ;;  %v2503_v20 = vpop.f32.mrb[11].mxu1  ;;  %v2574_v26 = vmul.f32 %v5517_v60, %v5517_v60 }
 0x285   : > { %v2573_v22 = vmul.f32 %v5520_v6, %v5520_v6  ;;  %v5538_v23 = vadd.f32 %v2164_v19, %v5431_v0  ;;  %v5541_v24 = vadd.f32 %v2503_v20, %v5433_v2  ;;  %2633 = vadd.xlane.f32.xlu1 %v2632_v10  ;;  %v2637_v31 = vadd.f32 %v2636_v13, %v2571_v21 }
 0x286   : > { %v2576_v25 = vmul.f32 %v5528_v15, %v5528_v15  ;;  %v2575_v34 = vmul.f32 %v5523_v7, %v5523_v7  ;;  %v2578_v35 = vmul.f32 %v5531_v18, %v5531_v18 }
 0x287   : > { %v2640_v27 = vadd.f32 %v2573_v22, %v2572_v14  ;;  %v2577_v30 = vmul.f32 %v5538_v23, %v5538_v23  ;;  %v2579_v54 = vmul.f32 %v5541_v24, %v5541_v24 }
 0x289   : > { %v2645_v36 = vadd.f32 %v2577_v30, %v2576_v25  ;;  %v2168_v37 = vpop.f32.mrb[12].mxu0  ;;  %v2507_v38 = vpop.f32.mrb[12].mxu1  ;;  %2638 = vadd.xlane.f32.xlu1 %v2637_v31  ;;  %v2641_v41 = vadd.f32 %v2640_v27, %v2574_v26 }
 0x28a   : > { %v5554_v42 = vadd.f32 %v2168_v37, %v5427_v61  ;;  %v5557_v43 = vadd.f32 %v2507_v38, %v5429_v63  ;;  %v2170_v44 = vpop.f32.mrb[13].mxu0  ;;  %v2509_v47 = vpop.f32.mrb[13].mxu1 }
 0x28b   : > { %v5560_v48 = vadd.f32 %v2170_v44, %v5431_v0  ;;  %v5563_v49 = vadd.f32 %v2509_v47, %v5433_v2  ;;  %v2172_v50 = vpop.f32.mrb[14].mxu0  ;;  %v2511_v51 = vpop.f32.mrb[14].mxu1  ;;  %v2642_v52 = vadd.f32 %v2641_v41, %v2575_v34  ;;  %v2646_v53 = vadd.f32 %v2645_v36, %v2578_v35 }
 0x28c   : > { %v2580_v55 = vmul.f32 %v5554_v42, %v5554_v42  ;;  %v5570_v56 = vadd.f32 %v2172_v50, %v5427_v61  ;;  %v5573_v57 = vadd.f32 %v2511_v51, %v5429_v63  ;;  %v2174_v3 = vpop.f32.mrb[15].mxu0  ;;  %v2513_v4 = vpop.f32.mrb[15].mxu1  ;;  %v2582_v19 = vmul.f32 %v5557_v43, %v5557_v43 }
 0x28d   : > { %v2581_v8 = vmul.f32 %v5560_v48, %v5560_v48  ;;  %v5578_v9 = vadd.f32 %v2174_v3, %v5431_v0  ;;  %v5581_v10 = vadd.f32 %v2513_v4, %v5433_v2  ;;  %2643 = vadd.xlane.f32.xlu0 %v2642_v52  ;;  %v2647_v14 = vadd.f32 %v2646_v53, %v2579_v54 }
 0x28e   : > { %v2584_v13 = vmul.f32 %v5570_v56, %v5570_v56  ;;  %v2583_v22 = vmul.f32 %v5563_v49, %v5563_v49  ;;  %v2586_v25 = vmul.f32 %v5573_v57, %v5573_v57 }
 0x28f   : > { %v2650_v20 = vadd.f32 %v2581_v8, %v2580_v55  ;;  %v2585_v21 = vmul.f32 %v5578_v9, %v5578_v9  ;;  %2648 = vadd.xlane.f32.xlu1 %v2647_v14  ;;  %v2587_v52 = vmul.f32 %v5581_v10, %v5581_v10 }
 0x291   : > { %v2655_v26 = vadd.f32 %v2585_v21, %v2584_v13  ;;  %v2178_v27 = vpop.f32.mrb[16].mxu0  ;;  %v2517_v30 = vpop.f32.mrb[16].mxu1  ;;  %v2651_v31 = vadd.f32 %v2650_v20, %v2582_v19 }
 0x292   : > { %v5594_v34 = vadd.f32 %v2178_v27, %v5427_v61  ;;  %v5597_v35 = vadd.f32 %v2517_v30, %v5429_v63  ;;  %v2180_v36 = vpop.f32.mrb[17].mxu0  ;;  %v2519_v37 = vpop.f32.mrb[17].mxu1 }
 0x293   : > { %v5600_v38 = vadd.f32 %v2180_v36, %v5431_v0  ;;  %v5603_v41 = vadd.f32 %v2519_v37, %v5433_v2  ;;  %v2182_v44 = vpop.f32.mrb[18].mxu0  ;;  %v2521_v47 = vpop.f32.mrb[18].mxu1  ;;  %v2652_v50 = vadd.f32 %v2651_v31, %v2583_v22  ;;  %v2656_v51 = vadd.f32 %v2655_v26, %v2586_v25 }
 0x294   : > { %v2588_v53 = vmul.f32 %v5594_v34, %v5594_v34  ;;  %v5610_v54 = vadd.f32 %v2182_v44, %v5427_v61  ;;  %v5613_v55 = vadd.f32 %v2521_v47, %v5429_v63  ;;  %v2184_v3 = vpop.f32.mrb[19].mxu0  ;;  %v2523_v4 = vpop.f32.mrb[19].mxu1  ;;  %v2590_v21 = vmul.f32 %v5597_v35, %v5597_v35 }
 0x295   : > { %v2589_v8 = vmul.f32 %v5600_v38, %v5600_v38  ;;  %v5618_v13 = vadd.f32 %v2184_v3, %v5431_v0  ;;  %v5621_v14 = vadd.f32 %v2523_v4, %v5433_v2  ;;  %2653 = vadd.xlane.f32.xlu0 %v2652_v50  ;;  %v2657_v20 = vadd.f32 %v2656_v51, %v2587_v52 }
 0x296   : > { %v2592_v19 = vmul.f32 %v5610_v54, %v5610_v54  ;;  %v2591_v26 = vmul.f32 %v5603_v41, %v5603_v41  ;;  %v2594_v27 = vmul.f32 %v5613_v55, %v5613_v55 }
 0x297   : > { %6022 = vst [vmem:[#allocation24_spill] sm:$0xff] %v5621_v14  ;;  %v2660_v22 = vadd.f32 %v2589_v8, %v2588_v53  ;;  %v2593_v25 = vmul.f32 %v5618_v13, %v5618_v13  ;;  %2658 = vadd.xlane.f32.xlu1 %v2657_v20  ;;  %v2595_v20 = vmul.f32 %v5621_v14, %v5621_v14 }
 0x299   : > { %v2665_v30 = vadd.f32 %v2593_v25, %v2592_v19  ;;  %v2188_v31 = vpop.f32.mrb[20].mxu0  ;;  %v2527_v36 = vpop.f32.mrb[20].mxu1  ;;  %v2661_v37 = vadd.f32 %v2660_v22, %v2590_v21 }
 0x29a   : > { %v5634_v44 = vadd.f32 %v2188_v31, %v5427_v61  ;;  %v5637_v47 = vadd.f32 %v2527_v36, %v5429_v63  ;;  %v2190_v50 = vpop.f32.mrb[21].mxu0  ;;  %v2529_v51 = vpop.f32.mrb[21].mxu1 }
 0x29b   : > { %v5640_v52 = vadd.f32 %v2190_v50, %v5431_v0  ;;  %v5643_v53 = vadd.f32 %v2529_v51, %v5433_v2  ;;  %v2192_v3 = vpop.f32.mrb[22].mxu0  ;;  %v2531_v4 = vpop.f32.mrb[22].mxu1  ;;  %v2662_v8 = vadd.f32 %v2661_v37, %v2591_v26  ;;  %v2666_v19 = vadd.f32 %v2665_v30, %v2594_v27 }
 0x29c   : > { %6023 = vst [vmem:[#allocation25_spill] sm:$0xff] %v5634_v44  ;;  %6024 = vst [vmem:[#allocation26_spill] sm:$0xff] %v5637_v47  ;;  %v2596_v21 = vmul.f32 %v5634_v44, %v5634_v44  ;;  %v5650_v22 = vadd.f32 %v2192_v3, %v5427_v61  ;;  %v5653_v25 = vadd.f32 %v2531_v4, %v5429_v63  ;;  %v2194_v31 = vpop.f32.mrb[23].mxu0  ;;  %v2533_v36 = vpop.f32.mrb[23].mxu1 }
 0x29d   : > { %6025 = vst [vmem:[#allocation27_spill] sm:$0xff] %v5640_v52  ;;  %6026 = vst [vmem:[#allocation28_spill] sm:$0xff] %v5643_v53  ;;  %v2597_v50 = vmul.f32 %v5640_v52, %v5640_v52  ;;  %v5658_v26 = vadd.f32 %v2194_v31, %v5431_v0  ;;  %v5661_v27 = vadd.f32 %v2533_v36, %v5433_v2  ;;  %2663 = vadd.xlane.f32.xlu0 %v2662_v8 }
 0x29e   : > { %6027 = vst [vmem:[#allocation29_spill] sm:$0xff] %v5650_v22  ;;  %6028 = vst [vmem:[#allocation30_spill] sm:$0xff] %v5653_v25  ;;  %v2600_v30 = vmul.f32 %v5650_v22, %v5650_v22  ;;  %v2667_v37 = vadd.f32 %v2666_v19, %v2595_v20  ;;  %v2598_v51 = vmul.f32 %v5637_v47, %v5637_v47 }
 0x29f   : > { %6029 = vst [vmem:[#allocation31_spill] sm:$0xff] %v5658_v26  ;;  %6030 = vst [vmem:[#allocation32_spill] sm:$0xff] %v5661_v27  ;;  %v2670_v3 = vadd.f32 %v2597_v50, %v2596_v21  ;;  %v2601_v4 = vmul.f32 %v5658_v26, %v5658_v26  ;;  %v2599_v31 = vmul.f32 %v5643_v53, %v5643_v53 }
 0x2a0   : > { %2668 = vadd.xlane.f32.xlu1 %v2667_v37  ;;  %v2602_v36 = vmul.f32 %v5653_v25, %v5653_v25 }
 0x2a1   : > { %v2675_v52 = vadd.f32 %v2601_v4, %v2600_v30  ;;  %v2198_v8 = vpop.f32.mrb[24].mxu0  ;;  %v2537_v44 = vpop.f32.mrb[24].mxu1  ;;  %v2671_v14 = vadd.f32 %v2670_v3, %v2598_v51  ;;  %v2603_v51 = vmul.f32 %v5661_v27, %v5661_v27 }
 0x2a2   : > { %v5674_v19 = vadd.f32 %v2198_v8, %v5427_v61  ;;  %v5677_v20 = vadd.f32 %v2537_v44, %v5429_v63  ;;  %v2200_v21 = vpop.f32.mrb[25].mxu0  ;;  %v2539_v50 = vpop.f32.mrb[25].mxu1 }
 0x2a3   : > { %v5680_v37 = vadd.f32 %v2200_v21, %v5431_v0  ;;  %v5683_v26 = vadd.f32 %v2539_v50, %v5433_v2  ;;  %v2202_v22 = vpop.f32.mrb[26].mxu0  ;;  %v2541_v25 = vpop.f32.mrb[26].mxu1  ;;  %v2672_v30 = vadd.f32 %v2671_v14, %v2599_v31  ;;  %v2676_v4 = vadd.f32 %v2675_v52, %v2602_v36 }
 0x2a4   : > { %6031 = vst [vmem:[#allocation33_spill] sm:$0xff] %v5674_v19  ;;  %v2604_v3 = vmul.f32 %v5674_v19, %v5674_v19  ;;  %v5690_v44 = vadd.f32 %v2202_v22, %v5427_v61  ;;  %v5693_v8 = vadd.f32 %v2541_v25, %v5429_v63  ;;  %v2204_v21 = vpop.f32.mrb[27].mxu0  ;;  %v2543_v53 = vpop.f32.mrb[27].mxu1  ;;  %v2606_v25 = vmul.f32 %v5677_v20, %v5677_v20 }
 0x2a5   : > { %6032 = vst [vmem:[#allocation34_spill] sm:$0xff] %v5680_v37  ;;  %6033 = vst [vmem:[#allocation35_spill] sm:$0xff] %v5683_v26  ;;  %v2605_v50 = vmul.f32 %v5680_v37, %v5680_v37  ;;  %v5698_v14 = vadd.f32 %v2204_v21, %v5431_v0  ;;  %v5701_v52 = vadd.f32 %v2543_v53, %v5433_v2  ;;  %2673 = vadd.xlane.f32.xlu0 %v2672_v30 }
 0x2a6   : > { %6034 = vst [vmem:[#allocation36_spill] sm:$0xff] %v5690_v44  ;;  %6035 = vst [vmem:[#allocation37_spill] sm:$0xff] %v5693_v8  ;;  %v2608_v31 = vmul.f32 %v5690_v44, %v5690_v44  ;;  %v2677_v22 = vadd.f32 %v2676_v4, %v2603_v51  ;;  %v2607_v21 = vmul.f32 %v5683_v26, %v5683_v26 }
 0x2a7   : > { %6036 = vst [vmem:[#allocation38_spill] sm:$0xff] %v5698_v14  ;;  %v2680_v36 = vadd.f32 %v2605_v50, %v2604_v3  ;;  %v2609_v19 = vmul.f32 %v5698_v14, %v5698_v14  ;;  %v2610_v53 = vmul.f32 %v5693_v8, %v5693_v8 }
 0x2a8   : > { %2678 = vadd.xlane.f32.xlu1 %v2677_v22 }
 0x2a9   : > { %v2685_v37 = vadd.f32 %v2609_v19, %v2608_v31  ;;  %v2208_v30 = vpop.f32.mrb[28].mxu0  ;;  %v2547_v27 = vpop.f32.mrb[28].mxu1  ;;  %v2681_v47 = vadd.f32 %v2680_v36, %v2606_v25  ;;  %v2611_v25 = vmul.f32 %v5701_v52, %v5701_v52 }
 0x2aa   : > { %v5714_v4 = vadd.f32 %v2208_v30, %v5427_v61  ;;  %v5717_v51 = vadd.f32 %v2547_v27, %v5429_v63  ;;  %v2210_v3 = vpop.f32.mrb[29].mxu0  ;;  %v2549_v50 = vpop.f32.mrb[29].mxu1 }
 0x2ab   : > { %v5720_v22 = vadd.f32 %v2210_v3, %v5431_v0  ;;  %v5723_v14 = vadd.f32 %v2549_v50, %v5433_v2  ;;  %v2212_v44 = vpop.f32.mrb[30].mxu0  ;;  %v2551_v8 = vpop.f32.mrb[30].mxu1  ;;  %v2682_v19 = vadd.f32 %v2681_v47, %v2607_v21  ;;  %v2686_v31 = vadd.f32 %v2685_v37, %v2610_v53 }
 0x2ac   : > { %v2612_v36 = vmul.f32 %v5714_v4, %v5714_v4  ;;  %v5730_v27 = vadd.f32 %v2212_v44, %v5427_v61  ;;  %v5733_v30 = vadd.f32 %v2551_v8, %v5429_v63  ;;  %v2214_v3 = vpop.f32.mrb[31].mxu0  ;;  %v2553_v26 = vpop.f32.mrb[31].mxu1  ;;  %v2614_v63 = vmul.f32 %v5717_v51, %v5717_v51 }
 0x2ad   : > { %6037 = vst [vmem:[#allocation39_spill] sm:$0xff] %v5723_v14  ;;  %v2613_v50 = vmul.f32 %v5720_v22, %v5720_v22  ;;  %v5738_v47 = vadd.f32 %v2214_v3, %v5431_v0  ;;  %v5741_v37 = vadd.f32 %v2553_v26, %v5433_v2  ;;  %2683 = vadd.xlane.f32.xlu0 %v2682_v19 }
 0x2ae   : > { %6038 = vst [vmem:[#allocation40_spill] sm:$0xff] %v5730_v27  ;;  %6039 = vst [vmem:[#allocation41_spill] sm:$0xff] %v5733_v30  ;;  %v2616_v21 = vmul.f32 %v5730_v27, %v5730_v27  ;;  %v2687_v61 = vadd.f32 %v2686_v31, %v2611_v25  ;;  %v2615_v0 = vmul.f32 %v5723_v14, %v5723_v14 }
 0x2af   : > { %6040 = vst [vmem:[#allocation42_spill] sm:$0xff] %v5738_v47  ;;  %v2690_v44 = vadd.f32 %v2613_v50, %v2612_v36  ;;  %v2617_v8 = vmul.f32 %v5738_v47, %v5738_v47  ;;  %v2618_v2 = vmul.f32 %v5733_v30, %v5733_v30  ;;  %v2619_v19 = vmul.f32 %v5741_v37, %v5741_v37 }
 0x2b0   : > { %2688 = vadd.xlane.f32.xlu1 %v2687_v61 }
 0x2b1   : > { %v2695_v26 = vadd.f32 %v2617_v8, %v2616_v21  ;;  %v2691_v53 = vadd.f32 %v2690_v44, %v2614_v63 }
 0x2b3   : > { %v2692_v31 = vadd.f32 %v2691_v53, %v2615_v0  ;;  %v2696_v25 = vadd.f32 %v2695_v26, %v2618_v2 }
 0x2b5   : > { %2693 = vadd.xlane.f32.xlu0 %v2692_v31  ;;  %v2697_v3 = vadd.f32 %v2696_v25, %v2619_v19 }
 0x2b7   : > { %2698 = vadd.xlane.f32.xlu1 %v2697_v3 }
 0x30a   : > { %v2624_v36 = vpop.xlane.xlu0 %2623 }
 0x30b   : > { %v2700_v50 = vmax.f32 %v2624_v36, 1e-24 }
 0x30d   : > { %4676 = vrsqrt.f32 %v2700_v50 }
 0x30e   : > { %v2629_v61 = vpop.xlane.xlu0 %2628 }
 0x30f   : > { %v2701_v47 = vmax.f32 %v2629_v61, 1e-24 }
 0x311   : > { %4678 = vrsqrt.f32 %v2701_v47 }
 0x312   : > { %v2634_v27 = vpop.xlane.xlu1 %2633 }
 0x313   : > { %v2702_v14 = vmax.f32 %v2634_v27, 1e-24 }
 0x315   : > { %4680 = vrsqrt.f32 %v2702_v14 }
 0x316   : > { %v2639_v30 = vpop.xlane.xlu1 %2638 }
 0x317   : > { %v4677_v21 = vpop.eup %4676  ;;  %v2703_v63 = vmax.f32 %v2639_v30, 1e-24 }
 0x318   : > { %v2732_v44 = vmul.f32 %v4677_v21, %v5436_v1  ;;  %v2733_v2 = vmul.f32 %v4677_v21, %v5442_v58  ;;  %v2734_v26 = vmul.f32 %v4677_v21, %v5439_v5  ;;  %v2735_v53 = vmul.f32 %v4677_v21, %v5445_v62 }
 0x319   : > { %4682 = vrsqrt.f32 %v2703_v63 }
 0x31a   : > { %v2644_v8 = vpop.xlane.xlu0 %2643 }
 0x31b   : > { %v4679_v0 = vpop.eup %4678  ;;  %v2704_v19 = vmax.f32 %v2644_v8, 1e-24 }
 0x31c   : > { %v2736_v47 = vmul.f32 %v4679_v0, %v5450_v11  ;;  %v2737_v27 = vmul.f32 %v4679_v0, %v5458_v16  ;;  %v2738_v14 = vmul.f32 %v4679_v0, %v5453_v12  ;;  %v2739_v30 = vmul.f32 %v4679_v0, %v5461_v17  ;;  %v2649_v31 = vpop.xlane.xlu1 %2648 }
 0x31d   : > { %4684 = vrsqrt.f32 %v2704_v19  ;;  %v2705_v50 = vmax.f32 %v2649_v31, 1e-24 }
 0x31e   : > { %v2796_v1 = vpack.c.bf16 %v2736_v47, %v2732_v44  ;;  %v2797_v25 = vpack.c.bf16 %v2737_v27, %v2733_v2  ;;  %v2798_v3 = vpack.c.bf16 %v2738_v14, %v2734_v26  ;;  %v2799_v36 = vpack.c.bf16 %v2739_v30, %v2735_v53 }
 0x31f   : > { %v4681_v58 = vpop.eup %4680  ;;  %4686 = vrsqrt.f32 %v2705_v50 }
 0x320   : > { %2828 = vst [vmem:[#allocation3] sm:$0xff] %v2796_v1  ;;  %2829 = vst [vmem:[#allocation3 + $0x8] sm:$0xff] %v2797_v25  ;;  %v2740_v5 = vmul.f32 %v4681_v58, %v5474_v28  ;;  %v2741_v12 = vmul.f32 %v4681_v58, %v5480_v32  ;;  %v2742_v16 = vmul.f32 %v4681_v58, %v5477_v29 }
 0x321   : > { %2830 = vst [vmem:[#allocation3 + $0x10] sm:$0xff] %v2798_v3  ;;  %2831 = vst [vmem:[#allocation3 + $0x18] sm:$0xff] %v2799_v36  ;;  %v2743_v17 = vmul.f32 %v4681_v58, %v5483_v33 }
 0x322   : > { %v2654_v62 = vpop.xlane.xlu0 %2653 }
 0x323   : > { %v4683_v11 = vpop.eup %4682  ;;  %v2706_v61 = vmax.f32 %v2654_v62, 1e-24 }
 0x324   : > { %v2744_v21 = vmul.f32 %v4683_v11, %v5488_v39  ;;  %v2745_v63 = vmul.f32 %v4683_v11, %v5498_v45  ;;  %v2746_v44 = vmul.f32 %v4683_v11, %v5491_v40  ;;  %v2747_v8 = vmul.f32 %v4683_v11, %v5501_v46  ;;  %v2659_v0 = vpop.xlane.xlu1 %2658 }
 0x325   : > { %4688 = vrsqrt.f32 %v2706_v61  ;;  %v2707_v19 = vmax.f32 %v2659_v0, 1e-24 }
 0x326   : > { %v2800_v28 = vpack.c.bf16 %v2744_v21, %v2740_v5  ;;  %v2801_v2 = vpack.c.bf16 %v2745_v63, %v2741_v12  ;;  %v2802_v26 = vpack.c.bf16 %v2746_v44, %v2742_v16  ;;  %v2803_v53 = vpack.c.bf16 %v2747_v8, %v2743_v17 }
 0x327   : > { %v4685_v32 = vpop.eup %4684  ;;  %4690 = vrsqrt.f32 %v2707_v19 }
 0x328   : > { %2832 = vst [vmem:[#allocation3 + $0x20] sm:$0xff] %v2800_v28  ;;  %2833 = vst [vmem:[#allocation3 + $0x28] sm:$0xff] %v2801_v2  ;;  %v2748_v29 = vmul.f32 %v4685_v32, %v5514_v59  ;;  %v2749_v40 = vmul.f32 %v4685_v32, %v5520_v6  ;;  %v2750_v45 = vmul.f32 %v4685_v32, %v5517_v60  ;;  %v6041_v2 = vld [vmem:[#allocation24_spill] sm:$0xff] }
 0x329   : > { %2834 = vst [vmem:[#allocation3 + $0x30] sm:$0xff] %v2802_v26  ;;  %2835 = vst [vmem:[#allocation3 + $0x38] sm:$0xff] %v2803_v53  ;;  %v4687_v39 = vpop.eup %4686  ;;  %v2751_v46 = vmul.f32 %v4685_v32, %v5523_v7 }
 0x32a   : > { %v2664_v33 = vpop.xlane.xlu0 %2663  ;;  %v2752_v27 = vmul.f32 %v4687_v39, %v5528_v15  ;;  %v2753_v14 = vmul.f32 %v4687_v39, %v5538_v23  ;;  %v2754_v30 = vmul.f32 %v4687_v39, %v5531_v18  ;;  %v2755_v31 = vmul.f32 %v4687_v39, %v5541_v24 }
 0x32b   : > { %v2708_v47 = vmax.f32 %v2664_v33, 1e-24 }
 0x32c   : > { %v2804_v59 = vpack.c.bf16 %v2752_v27, %v2748_v29  ;;  %v2805_v25 = vpack.c.bf16 %v2753_v14, %v2749_v40  ;;  %v2806_v3 = vpack.c.bf16 %v2754_v30, %v2750_v45  ;;  %v2807_v36 = vpack.c.bf16 %v2755_v31, %v2751_v46  ;;  %v6044_v40 = vld [vmem:[#allocation26_spill] sm:$0xff]  ;;  %v6045_v46 = vld [vmem:[#allocation28_spill] sm:$0xff]  ;;  %v6046_v14 = vld [vmem:[#allocation29_spill] sm:$0xff] }
 0x32d   : > { %4692 = vrsqrt.f32 %v2708_v47  ;;  %v2669_v1 = vpop.xlane.xlu1 %2668  ;;  %v6047_v31 = vld [vmem:[#allocation31_spill] sm:$0xff] }
 0x32e   : > { %v2709_v58 = vmax.f32 %v2669_v1, 1e-24  ;;  %2836 = vst [vmem:[#allocation3 + $0x40] sm:$0xff] %v2804_v59  ;;  %2837 = vst [vmem:[#allocation3 + $0x48] sm:$0xff] %v2805_v25  ;;  %v6048_v59 = vld [vmem:[#allocation30_spill] sm:$0xff] }
 0x32f   : > { %v4689_v6 = vpop.eup %4688  ;;  %2838 = vst [vmem:[#allocation3 + $0x50] sm:$0xff] %v2806_v3  ;;  %2839 = vst [vmem:[#allocation3 + $0x58] sm:$0xff] %v2807_v36  ;;  %v6049_v3 = vld [vmem:[#allocation32_spill] sm:$0xff] }
 0x330   : > { %4694 = vrsqrt.f32 %v2709_v58  ;;  %v2756_v60 = vmul.f32 %v4689_v6, %v5554_v42  ;;  %v2757_v18 = vmul.f32 %v4689_v6, %v5560_v48  ;;  %v2758_v23 = vmul.f32 %v4689_v6, %v5557_v43 }
 0x331   : > { %v4691_v15 = vpop.eup %4690  ;;  %v2759_v24 = vmul.f32 %v4689_v6, %v5563_v49 }
 0x332   : > { %v2674_v7 = vpop.xlane.xlu0 %2673  ;;  %v2760_v5 = vmul.f32 %v4691_v15, %v5570_v56  ;;  %v2761_v62 = vmul.f32 %v4691_v15, %v5578_v9  ;;  %v2762_v11 = vmul.f32 %v4691_v15, %v5573_v57  ;;  %v2763_v12 = vmul.f32 %v4691_v15, %v5581_v10 }
 0x333   : > { %v2710_v50 = vmax.f32 %v2674_v7, 1e-24 }
 0x334   : > { %v2808_v42 = vpack.c.bf16 %v2760_v5, %v2756_v60  ;;  %v2809_v17 = vpack.c.bf16 %v2761_v62, %v2757_v18  ;;  %v2810_v61 = vpack.c.bf16 %v2762_v11, %v2758_v23  ;;  %v2811_v21 = vpack.c.bf16 %v2763_v12, %v2759_v24  ;;  %v6051_v62 = vld [vmem:[#allocation34_spill] sm:$0xff] }
 0x335   : > { %4696 = vrsqrt.f32 %v2710_v50  ;;  %v2679_v16 = vpop.xlane.xlu1 %2678  ;;  %v6050_v50 = vld [vmem:[#allocation33_spill] sm:$0xff] }
 0x336   : > { %v2711_v63 = vmax.f32 %v2679_v16, 1e-24  ;;  %2840 = vst [vmem:[#allocation3 + $0x60] sm:$0xff] %v2808_v42  ;;  %2841 = vst [vmem:[#allocation3 + $0x68] sm:$0xff] %v2809_v17  ;;  %v6052_v16 = vld [vmem:[#allocation35_spill] sm:$0xff]  ;;  %v6053_v17 = vld [vmem:[#allocation36_spill] sm:$0xff] }
 0x337   : > { %v4693_v48 = vpop.eup %4692  ;;  %2842 = vst [vmem:[#allocation3 + $0x70] sm:$0xff] %v2810_v61  ;;  %2843 = vst [vmem:[#allocation3 + $0x78] sm:$0xff] %v2811_v21  ;;  %v6054_v21 = vld [vmem:[#allocation38_spill] sm:$0xff] }
 0x338   : > { %4698 = vrsqrt.f32 %v2711_v63  ;;  %v2764_v43 = vmul.f32 %v4693_v48, %v5594_v34  ;;  %v2765_v57 = vmul.f32 %v4693_v48, %v5600_v38  ;;  %v2766_v9 = vmul.f32 %v4693_v48, %v5597_v35  ;;  %v6042_v35 = vld [vmem:[#allocation25_spill] sm:$0xff] }
 0x339   : > { %v2767_v10 = vmul.f32 %v4693_v48, %v5603_v41  ;;  %v6055_v63 = vld [vmem:[#allocation37_spill] sm:$0xff] }
 0x33a   : > { %v2684_v49 = vpop.xlane.xlu0 %2683  ;;  %v4695_v56 = vpop.eup %4694 }
 0x33b   : > { %v2712_v44 = vmax.f32 %v2684_v49, 1e-24  ;;  %v2768_v8 = vmul.f32 %v4695_v56, %v5610_v54  ;;  %v2769_v0 = vmul.f32 %v4695_v56, %v5618_v13  ;;  %v2770_v28 = vmul.f32 %v4695_v56, %v5613_v55  ;;  %v6043_v55 = vld [vmem:[#allocation27_spill] sm:$0xff] }
 0x33c   : > { %v2771_v26 = vmul.f32 %v4695_v56, %v6041_v2  ;;  %v6056_v2 = vld [vmem:[#allocation39_spill] sm:$0xff] }
 0x33d   : > { %4700 = vrsqrt.f32 %v2712_v44  ;;  %v2689_v53 = vpop.xlane.xlu1 %2688  ;;  %v2812_v34 = vpack.c.bf16 %v2768_v8, %v2764_v43  ;;  %v2813_v32 = vpack.c.bf16 %v2769_v0, %v2765_v57  ;;  %v2814_v19 = vpack.c.bf16 %v2770_v28, %v2766_v9 }
 0x33e   : > { %v2815_v29 = vpack.c.bf16 %v2771_v26, %v2767_v10  ;;  %v2713_v33 = vmax.f32 %v2689_v53, 1e-24  ;;  %v6057_v53 = vld [vmem:[#allocation40_spill] sm:$0xff] }
 0x33f   : > { %v4697_v38 = vpop.eup %4696  ;;  %2844 = vst [vmem:[#allocation3 + $0x80] sm:$0xff] %v2812_v34  ;;  %2845 = vst [vmem:[#allocation3 + $0x88] sm:$0xff] %v2813_v32  ;;  %v6058_v34 = vld [vmem:[#allocation42_spill] sm:$0xff] }
 0x340   : > { %2846 = vst [vmem:[#allocation3 + $0x90] sm:$0xff] %v2814_v19  ;;  %2847 = vst [vmem:[#allocation3 + $0x98] sm:$0xff] %v2815_v29  ;;  %4702 = vrsqrt.f32 %v2713_v33  ;;  %v2772_v41 = vmul.f32 %v4697_v38, %v6042_v35  ;;  %v2773_v39 = vmul.f32 %v4697_v38, %v6043_v55  ;;  %v2774_v45 = vmul.f32 %v4697_v38, %v6044_v40  ;;  %v6059_v19 = vld [vmem:[#allocation41_spill] sm:$0xff] }
 0x341   : > { %v2775_v47 = vmul.f32 %v4697_v38, %v6045_v46 }
 0x342   : > { %v2694_v54 = vpop.xlane.xlu0 %2693  ;;  %v4699_v13 = vpop.eup %4698 }
 0x343   : > { %v2714_v27 = vmax.f32 %v2694_v54, 1e-24  ;;  %v2776_v30 = vmul.f32 %v4699_v13, %v6046_v14  ;;  %v2777_v1 = vmul.f32 %v4699_v13, %v6047_v31  ;;  %v2778_v25 = vmul.f32 %v4699_v13, %v6048_v59 }
 0x344   : > { %v2779_v36 = vmul.f32 %v4699_v13, %v6049_v3  ;;  %v2699_v6 = vpop.xlane.xlu1 %2698 }
 0x345   : > { %4704 = vrsqrt.f32 %v2714_v27  ;;  %v2715_v58 = vmax.f32 %v2699_v6, 1e-24  ;;  %v2816_v60 = vpack.c.bf16 %v2776_v30, %v2772_v41  ;;  %v2817_v7 = vpack.c.bf16 %v2777_v1, %v2773_v39 }
 0x346   : > { %v2818_v15 = vpack.c.bf16 %v2778_v25, %v2774_v45  ;;  %v2819_v18 = vpack.c.bf16 %v2779_v36, %v2775_v47 }
 0x347   : > { %v4701_v23 = vpop.eup %4700  ;;  %4706 = vrsqrt.f32 %v2715_v58  ;;  %2848 = vst [vmem:[#allocation3 + $0xa0] sm:$0xff] %v2816_v60  ;;  %2849 = vst [vmem:[#allocation3 + $0xa8] sm:$0xff] %v2817_v7 }
 0x348   : > { %2850 = vst [vmem:[#allocation3 + $0xb0] sm:$0xff] %v2818_v15  ;;  %2851 = vst [vmem:[#allocation3 + $0xb8] sm:$0xff] %v2819_v18  ;;  %v2780_v5 = vmul.f32 %v4701_v23, %v6050_v50  ;;  %v2781_v11 = vmul.f32 %v4701_v23, %v6051_v62  ;;  %v2782_v12 = vmul.f32 %v4701_v23, %v5677_v20 }
 0x349   : > { %v2783_v42 = vmul.f32 %v4701_v23, %v6052_v16 }
 0x34a   : > { %v4703_v24 = vpop.eup %4702 }
 0x34b   : > { %v2784_v61 = vmul.f32 %v4703_v24, %v6053_v17  ;;  %v2785_v48 = vmul.f32 %v4703_v24, %v6054_v21  ;;  %v2786_v43 = vmul.f32 %v4703_v24, %v6055_v63  ;;  %v2787_v49 = vmul.f32 %v4703_v24, %v5701_v52 }
 0x34d   : > { %v2820_v56 = vpack.c.bf16 %v2784_v61, %v2780_v5  ;;  %v2821_v57 = vpack.c.bf16 %v2785_v48, %v2781_v11  ;;  %v2822_v9 = vpack.c.bf16 %v2786_v43, %v2782_v12  ;;  %v2823_v10 = vpack.c.bf16 %v2787_v49, %v2783_v42 }
 0x34f   : > { %v4705_v44 = vpop.eup %4704  ;;  %2852 = vst [vmem:[#allocation3 + $0xc0] sm:$0xff] %v2820_v56  ;;  %2853 = vst [vmem:[#allocation3 + $0xc8] sm:$0xff] %v2821_v57 }
 0x350   : > { %2854 = vst [vmem:[#allocation3 + $0xd0] sm:$0xff] %v2822_v9  ;;  %2855 = vst [vmem:[#allocation3 + $0xd8] sm:$0xff] %v2823_v10  ;;  %v2788_v8 = vmul.f32 %v4705_v44, %v5714_v4  ;;  %v2789_v0 = vmul.f32 %v4705_v44, %v5720_v22  ;;  %v2790_v28 = vmul.f32 %v4705_v44, %v5717_v51 }
 0x351   : > { %v4707_v20 = vpop.eup %4706  ;;  %v2791_v26 = vmul.f32 %v4705_v44, %v6056_v2 }
 0x352   : > { %v2792_v52 = vmul.f32 %v4707_v20, %v6057_v53  ;;  %v2793_v32 = vmul.f32 %v4707_v20, %v6058_v34  ;;  %v2794_v29 = vmul.f32 %v4707_v20, %v6059_v19  ;;  %v2795_v38 = vmul.f32 %v4707_v20, %v5741_v37 }
 0x354   : > { %v2824_v33 = vpack.c.bf16 %v2792_v52, %v2788_v8  ;;  %v2825_v35 = vpack.c.bf16 %v2793_v32, %v2789_v0  ;;  %v2826_v41 = vpack.c.bf16 %v2794_v29, %v2790_v28  ;;  %v2827_v54 = vpack.c.bf16 %v2795_v38, %v2791_v26 }
 0x356   : > { %2856 = vst [vmem:[#allocation3 + $0xe0] sm:$0xff] %v2824_v33  ;;  %2857 = vst [vmem:[#allocation3 + $0xe8] sm:$0xff] %v2825_v35 }
 0x357   : > { %2858 = vst [vmem:[#allocation3 + $0xf0] sm:$0xff] %v2826_v41  ;;  %2859 = vst [vmem:[#allocation3 + $0xf8] sm:$0xff] %v2827_v54 }
 0x358 PF: > { %v4708_v4 = vld [vmem:[%s5392_s4 + $0x4] ss:$16 sps:$4 sm:$0xff]   ;;  %v4710_v51 = vld [vmem:[%s5392_s4 + $0xc] ss:$16 sps:$4 sm:$0xff]   ;;  %v4712_v22 = vld [vmem:[%s5392_s4] ss:$16 sps:$4 sm:$0xff]  }
 0x359   : > { %3264 = vmatprep.subr.bf16.mxu0 %v4708_v4  ;;  %v4713_v37 = vld [vmem:[%s5392_s4 + $0x8] ss:$16 sps:$4 sm:$0xff]   ;;  %3307 = vmatprep.subr.bf16.mxu1 %v4710_v51  ;;  %v4714_v13 = vld [vmem:[%s5392_s4 + $0x24] ss:$16 sps:$4 sm:$0xff]   ;;  %v4716_v55 = vld [vmem:[%s5392_s4 + $0x2c] ss:$16 sps:$4 sm:$0xff]  }
 0x35a   : > { %3265 = vmatpush1.bf16.msra.mxu0 %v4712_v22  ;;  %3308 = vmatpush1.bf16.msra.mxu1 %v4713_v37  ;;  %v4718_v39 = vld [vmem:[%s5392_s4 + $0x20] ss:$16 sps:$4 sm:$0xff]   ;;  %v4719_v40 = vld [vmem:[%s5392_s4 + $0x28] ss:$16 sps:$4 sm:$0xff]   ;;  %v4720_v45 = vld [vmem:[%s5392_s4 + $0x44] ss:$16 sps:$4 sm:$0xff]  }
 0x35b   : > { %3266 = vmatprep.subr.bf16.mxu0 %v4714_v13  ;;  %3309 = vmatprep.subr.bf16.mxu1 %v4716_v55  ;;  %v4722_v46 = vld [vmem:[%s5392_s4 + $0x4c] ss:$16 sps:$4 sm:$0xff]   ;;  %v4724_v47 = vld [vmem:[%s5392_s4 + $0x40] ss:$16 sps:$4 sm:$0xff]   ;;  %v4725_v27 = vld [vmem:[%s5392_s4 + $0x48] ss:$16 sps:$4 sm:$0xff]  }
 0x35c   : > { %v4726_v14 = vld [vmem:[%s5392_s4 + $0x64] ss:$16 sps:$4 sm:$0xff]   ;;  %v4728_v30 = vld [vmem:[%s5392_s4 + $0x6c] ss:$16 sps:$4 sm:$0xff]   ;;  %v4730_v31 = vld [vmem:[%s5392_s4 + $0x60] ss:$16 sps:$4 sm:$0xff]  }
 0x35d   : > { %v4731_v1 = vld [vmem:[%s5392_s4 + $0x68] ss:$16 sps:$4 sm:$0xff]   ;;  %v4732_v59 = vld [vmem:[%s5392_s4 + $0x84] ss:$16 sps:$4 sm:$0xff]   ;;  %v4734_v25 = vld [vmem:[%s5392_s4 + $0x8c] ss:$16 sps:$4 sm:$0xff]  }
 0x35e   : > { %3267 = vmatpush1.bf16.msra.mxu0 %v4718_v39  ;;  %3310 = vmatpush1.bf16.msra.mxu1 %v4719_v40  ;;  %v4736_v3 = vld [vmem:[%s5392_s4 + $0x80] ss:$16 sps:$4 sm:$0xff]   ;;  %v4737_v36 = vld [vmem:[%s5392_s4 + $0x88] ss:$16 sps:$4 sm:$0xff]   ;;  %v4738_v6 = vld [vmem:[%s5392_s4 + $0xa4] ss:$16 sps:$4 sm:$0xff]  }
 0x35f   : > { %3268 = vmatprep.subr.bf16.mxu0 %v4720_v45  ;;  %3311 = vmatprep.subr.bf16.mxu1 %v4722_v46  ;;  %v4740_v58 = vld [vmem:[%s5392_s4 + $0xac] ss:$16 sps:$4 sm:$0xff]   ;;  %v4742_v60 = vld [vmem:[%s5392_s4 + $0xa0] ss:$16 sps:$4 sm:$0xff]   ;;  %v4743_v7 = vld [vmem:[%s5392_s4 + $0xa8] ss:$16 sps:$4 sm:$0xff]  }
 0x360   : > { %v4744_v15 = vld [vmem:[%s5392_s4 + $0xc4] ss:$16 sps:$4 sm:$0xff]   ;;  %v4746_v18 = vld [vmem:[%s5392_s4 + $0xcc] ss:$16 sps:$4 sm:$0xff]   ;;  %v4748_v23 = vld [vmem:[%s5392_s4 + $0xc0] ss:$16 sps:$4 sm:$0xff]  }
 0x361   : > { %v4749_v24 = vld [vmem:[%s5392_s4 + $0xc8] ss:$16 sps:$4 sm:$0xff]   ;;  %v4750_v50 = vld [vmem:[%s5392_s4 + $0xe4] ss:$16 sps:$4 sm:$0xff]   ;;  %v4752_v5 = vld [vmem:[%s5392_s4 + $0xec] ss:$16 sps:$4 sm:$0xff]  }
 0x362   : > { %3269 = vmatpush1.bf16.msra.mxu0 %v4724_v47  ;;  %3312 = vmatpush1.bf16.msra.mxu1 %v4725_v27  ;;  %v4754_v62 = vld [vmem:[%s5392_s4 + $0xe0] ss:$16 sps:$4 sm:$0xff]   ;;  %v4755_v11 = vld [vmem:[%s5392_s4 + $0xe8] ss:$16 sps:$4 sm:$0xff]   ;;  %v4756_v12 = vld [vmem:[%s5392_s4 + $0x104] ss:$16 sps:$4 sm:$0xff]  }
 0x363   : > { %3270 = vmatprep.subr.bf16.mxu0 %v4726_v14  ;;  %3313 = vmatprep.subr.bf16.mxu1 %v4728_v30  ;;  %v4758_v16 = vld [vmem:[%s5392_s4 + $0x10c] ss:$16 sps:$4 sm:$0xff]   ;;  %v4760_v42 = vld [vmem:[%s5392_s4 + $0x100] ss:$16 sps:$4 sm:$0xff]   ;;  %v4761_v17 = vld [vmem:[%s5392_s4 + $0x108] ss:$16 sps:$4 sm:$0xff]  }
 0x364   : > { %v4762_v61 = vld [vmem:[%s5392_s4 + $0x124] ss:$16 sps:$4 sm:$0xff]   ;;  %v4764_v21 = vld [vmem:[%s5392_s4 + $0x12c] ss:$16 sps:$4 sm:$0xff]   ;;  %v4766_v48 = vld [vmem:[%s5392_s4 + $0x120] ss:$16 sps:$4 sm:$0xff]  }
 0x365   : > { %v4767_v63 = vld [vmem:[%s5392_s4 + $0x128] ss:$16 sps:$4 sm:$0xff]   ;;  %v4768_v43 = vld [vmem:[%s5392_s4 + $0x144] ss:$16 sps:$4 sm:$0xff]   ;;  %v4770_v49 = vld [vmem:[%s5392_s4 + $0x14c] ss:$16 sps:$4 sm:$0xff]  }
 0x366   : > { %3271 = vmatpush1.bf16.msra.mxu0 %v4730_v31  ;;  %3314 = vmatpush1.bf16.msra.mxu1 %v4731_v1  ;;  %v4772_v56 = vld [vmem:[%s5392_s4 + $0x140] ss:$16 sps:$4 sm:$0xff]   ;;  %v4773_v57 = vld [vmem:[%s5392_s4 + $0x148] ss:$16 sps:$4 sm:$0xff]   ;;  %v4774_v9 = vld [vmem:[%s5392_s4 + $0x164] ss:$16 sps:$4 sm:$0xff]  }
 0x367   : > { %3272 = vmatprep.subr.bf16.mxu0 %v4732_v59  ;;  %3315 = vmatprep.subr.bf16.mxu1 %v4734_v25  ;;  %v4776_v10 = vld [vmem:[%s5392_s4 + $0x16c] ss:$16 sps:$4 sm:$0xff]   ;;  %v4778_v20 = vld [vmem:[%s5392_s4 + $0x160] ss:$16 sps:$4 sm:$0xff]   ;;  %v4779_v8 = vld [vmem:[%s5392_s4 + $0x168] ss:$16 sps:$4 sm:$0xff]  }
 0x368   : > { %v4806_v44 = vld [vmem:[%s5385_s15 + $0x4] ss:$8 sps:$4 sm:$0xff]   ;;  %v4784_v2 = vld [vmem:[%s5392_s4 + $0x180] ss:$16 sps:$4 sm:$0xff]   ;;  %v4785_v26 = vld [vmem:[%s5392_s4 + $0x188] ss:$16 sps:$4 sm:$0xff]  }
 0x369   : > { %v4780_v0 = vld [vmem:[%s5392_s4 + $0x184] ss:$16 sps:$4 sm:$0xff]   ;;  %v4782_v28 = vld [vmem:[%s5392_s4 + $0x18c] ss:$16 sps:$4 sm:$0xff]   ;;  %3296 = vmatprep.mubr.bf16.mxu0 %v4806_v44  ;;  %3339 = vmatprep.mubr.bf16.mxu1 %v4806_v44  ;;  %v4790_v34 = vld [vmem:[%s5392_s4 + $0x1a0] ss:$16 sps:$4 sm:$0xff]  }
 0x36a   : > { %3273 = vmatpush1.bf16.msra.mxu0 %v4736_v3  ;;  %3316 = vmatpush1.bf16.msra.mxu1 %v4737_v36  ;;  %v4786_v53 = vld [vmem:[%s5392_s4 + $0x1a4] ss:$16 sps:$4 sm:$0xff]   ;;  %v4788_v52 = vld [vmem:[%s5392_s4 + $0x1ac] ss:$16 sps:$4 sm:$0xff]   ;;  %v4791_v32 = vld [vmem:[%s5392_s4 + $0x1a8] ss:$16 sps:$4 sm:$0xff]  }
 0x36b   : > { %3274 = vmatprep.subr.bf16.mxu0 %v4738_v6  ;;  %3317 = vmatprep.subr.bf16.mxu1 %v4740_v58  ;;  %v4792_v19 = vld [vmem:[%s5392_s4 + $0x1c4] ss:$16 sps:$4 sm:$0xff]   ;;  %v4794_v29 = vld [vmem:[%s5392_s4 + $0x1cc] ss:$16 sps:$4 sm:$0xff]   ;;  %v4796_v38 = vld [vmem:[%s5392_s4 + $0x1c0] ss:$16 sps:$4 sm:$0xff]  }
 0x36c   : > { %v4797_v33 = vld [vmem:[%s5392_s4 + $0x1c8] ss:$16 sps:$4 sm:$0xff]   ;;  %v4798_v35 = vld [vmem:[%s5392_s4 + $0x1e4] ss:$16 sps:$4 sm:$0xff]   ;;  %v4800_v41 = vld [vmem:[%s5392_s4 + $0x1ec] ss:$16 sps:$4 sm:$0xff]  }
 0x36d   : > { %v4802_v54 = vld [vmem:[%s5392_s4 + $0x1e0] ss:$16 sps:$4 sm:$0xff]   ;;  %v4803_v4 = vld [vmem:[%s5392_s4 + $0x1e8] ss:$16 sps:$4 sm:$0xff]   ;;  %p3997_p3 = scmp.ne.s32.totalorder %s5071_s29, 7 }
 0x36e   : > { %3275 = vmatpush1.bf16.msra.mxu0 %v4742_v60  ;;  %3318 = vmatpush1.bf16.msra.mxu1 %v4743_v7  ;;  %v4804_v51 = vld [vmem:[%s5385_s15] ss:$8 sps:$4 sm:$0xff]   ;;  %s3400_s29 = sld [smem:[#allocation5]] (!%p3997_p3) }
 0x36f   : > { %3276 = vmatprep.subr.bf16.mxu0 %v4744_v15  ;;  %3319 = vmatprep.subr.bf16.mxu1 %v4746_v18  ;;  %v2860_v22 = vld [vmem:[#allocation2] sm:$0xff]  ;;  %v2862_v37 = vld [vmem:[#allocation2 + $0x10] sm:$0xff]  ;;  %v2861_v13 = vld [vmem:[#allocation2 + $0x8] sm:$0xff] }
 0x370   : > { %v2863_v55 = vld [vmem:[#allocation2 + $0x18] sm:$0xff]  ;;  %v2864_v45 = vld [vmem:[#allocation2 + $0x20] sm:$0xff]  ;;  %v2866_v46 = vld [vmem:[#allocation2 + $0x30] sm:$0xff] }
 0x371   : > { %v2865_v31 = vld [vmem:[#allocation2 + $0x28] sm:$0xff]  ;;  %v2867_v1 = vld [vmem:[#allocation2 + $0x38] sm:$0xff] }
 0x372   : > { %3277 = vmatpush1.bf16.msra.mxu0 %v4748_v23  ;;  %3320 = vmatpush1.bf16.msra.mxu1 %v4749_v24 }
 0x373   : > { %3278 = vmatprep.subr.bf16.mxu0 %v4750_v50  ;;  %3321 = vmatprep.subr.bf16.mxu1 %v4752_v5 }
 0x376   : > { %3279 = vmatpush1.bf16.msra.mxu0 %v4754_v62  ;;  %3322 = vmatpush1.bf16.msra.mxu1 %v4755_v11 }
 0x377   : > { %3280 = vmatprep.subr.bf16.mxu0 %v4756_v12  ;;  %3323 = vmatprep.subr.bf16.mxu1 %v4758_v16 }
 0x37a   : > { %3281 = vmatpush1.bf16.msra.mxu0 %v4760_v42  ;;  %3324 = vmatpush1.bf16.msra.mxu1 %v4761_v17 }
 0x37b   : > { %3282 = vmatprep.subr.bf16.mxu0 %v4762_v61  ;;  %3325 = vmatprep.subr.bf16.mxu1 %v4764_v21 }
 0x37e   : > { %3283 = vmatpush1.bf16.msra.mxu0 %v4766_v48  ;;  %3326 = vmatpush1.bf16.msra.mxu1 %v4767_v63  ;;  %v3417_v63 = vld [vmem:[#allocation3 + $0x8] sm:$0xff] (!%p3997_p3) }
 0x37f   : > { %3284 = vmatprep.subr.bf16.mxu0 %v4768_v43  ;;  %3327 = vmatprep.subr.bf16.mxu1 %v4770_v49 }
 0x382   : > { %3285 = vmatpush1.bf16.msra.mxu0 %v4772_v56  ;;  %3328 = vmatpush1.bf16.msra.mxu1 %v4773_v57  ;;  %v3419_v57 = vld [vmem:[#allocation3 + $0x18] sm:$0xff] (!%p3997_p3) }
 0x383   : > { %3286 = vmatprep.subr.bf16.mxu0 %v4774_v9  ;;  %3329 = vmatprep.subr.bf16.mxu1 %v4776_v10  ;;  %v3416_v9 = vld [vmem:[#allocation3] sm:$0xff] (!%p3997_p3)  ;;  %v3418_v10 = vld [vmem:[#allocation3 + $0x10] sm:$0xff] (!%p3997_p3) }
 0x386   : > { %3287 = vmatpush1.bf16.msra.mxu0 %v4778_v20  ;;  %3330 = vmatpush1.bf16.msra.mxu1 %v4779_v8  ;;  %v3421_v20 = vld [vmem:[#allocation3 + $0x28] sm:$0xff] (!%p3997_p3)  ;;  %v3423_v8 = vld [vmem:[#allocation3 + $0x38] sm:$0xff] (!%p3997_p3) }
 0x387   : > { %3288 = vmatprep.subr.bf16.mxu0 %v4780_v0  ;;  %3331 = vmatprep.subr.bf16.mxu1 %v4782_v28 }
 0x38a   : > { %3289 = vmatpush1.bf16.msra.mxu0 %v4784_v2  ;;  %3332 = vmatpush1.bf16.msra.mxu1 %v4785_v26 }
 0x38b   : > { %3290 = vmatprep.subr.bf16.mxu0 %v4786_v53  ;;  %3333 = vmatprep.subr.bf16.mxu1 %v4788_v52  ;;  %v3420_v52 = vld [vmem:[#allocation3 + $0x20] sm:$0xff] (!%p3997_p3) }
 0x38e   : > { %3291 = vmatpush1.bf16.msra.mxu0 %v4790_v34  ;;  %3334 = vmatpush1.bf16.msra.mxu1 %v4791_v32  ;;  %v3422_v34 = vld [vmem:[#allocation3 + $0x30] sm:$0xff] (!%p3997_p3)  ;;  %v3425_v32 = vld [vmem:[#allocation3 + $0x48] sm:$0xff] (!%p3997_p3) }
 0x38f   : > { %3292 = vmatprep.subr.bf16.mxu0 %v4792_v19  ;;  %3335 = vmatprep.subr.bf16.mxu1 %v4794_v29  ;;  %v3427_v19 = vld [vmem:[#allocation3 + $0x58] sm:$0xff] (!%p3997_p3)  ;;  %v3424_v29 = vld [vmem:[#allocation3 + $0x40] sm:$0xff] (!%p3997_p3) }
 0x392   : > { %3293 = vmatpush1.bf16.msra.mxu0 %v4796_v38  ;;  %3336 = vmatpush1.bf16.msra.mxu1 %v4797_v33  ;;  %v3426_v38 = vld [vmem:[#allocation3 + $0x50] sm:$0xff] (!%p3997_p3)  ;;  %v3429_v33 = vld [vmem:[#allocation3 + $0x68] sm:$0xff] (!%p3997_p3) }
 0x393   : > { %3294 = vmatprep.subr.bf16.mxu0 %v4798_v35  ;;  %3337 = vmatprep.subr.bf16.mxu1 %v4800_v41  ;;  %v3431_v35 = vld [vmem:[#allocation3 + $0x78] sm:$0xff] (!%p3997_p3)  ;;  %v3428_v41 = vld [vmem:[#allocation3 + $0x60] sm:$0xff] (!%p3997_p3) }
 0x396   : > { %3295 = vmatpush1.bf16.msra.mxu0 %v4802_v54  ;;  %3338 = vmatpush1.bf16.msra.mxu1 %v4803_v4  ;;  %v3430_v54 = vld [vmem:[#allocation3 + $0x70] sm:$0xff] (!%p3997_p3)  ;;  %v3433_v4 = vld [vmem:[#allocation3 + $0x88] sm:$0xff] (!%p3997_p3) }
 0x397   : > { %3448 = vmatprep.subr.bf16.mxu1 (!%p3997_p3), %v3417_v63  ;;  %3489 = vmatprep.subr.bf16.mxu0 (!%p3997_p3), %v3419_v57 }
 0x399   : > { %3297 = vmatmul.mubr.bf16.vlgmr.msra.gmra.mrb[0].mxu0 %v4804_v51  ;;  %3340 = vmatmul.mubr.bf16.vlgmr.msra.gmra.mrb[0].mxu1 %v4804_v51  ;;  %v3435_v51 = vld [vmem:[#allocation3 + $0x98] sm:$0xff] (!%p3997_p3) }
 0x39f   : > { %3449 = vmatpush1.bf16.xpose.msra.mxu1 (!%p3997_p3), %v3416_v9  ;;  %3490 = vmatpush1.bf16.xpose.msra.mxu0 (!%p3997_p3), %v3418_v10 }
 0x3a0   : > { %3450 = vmatprep.subr.bf16.mxu1 (!%p3997_p3), %v3421_v20  ;;  %3491 = vmatprep.subr.bf16.mxu0 (!%p3997_p3), %v3423_v8 }
 0x3a7   : > { %3451 = vmatpush1.bf16.xpose.msra.mxu1 (!%p3997_p3), %v3420_v52  ;;  %3492 = vmatpush1.bf16.xpose.msra.mxu0 (!%p3997_p3), %v3422_v34 }
 0x3a8   : > { %3452 = vmatprep.subr.bf16.mxu1 (!%p3997_p3), %v3425_v32  ;;  %3493 = vmatprep.subr.bf16.mxu0 (!%p3997_p3), %v3427_v19 }
 0x3af   : > { %3453 = vmatpush1.bf16.xpose.msra.mxu1 (!%p3997_p3), %v3424_v29  ;;  %3494 = vmatpush1.bf16.xpose.msra.mxu0 (!%p3997_p3), %v3426_v38 }
 0x3b0   : > { %3454 = vmatprep.subr.bf16.mxu1 (!%p3997_p3), %v3429_v33  ;;  %3495 = vmatprep.subr.bf16.mxu0 (!%p3997_p3), %v3431_v35 }
 0x3b7   : > { %3455 = vmatpush1.bf16.xpose.msra.mxu1 (!%p3997_p3), %v3428_v41  ;;  %3496 = vmatpush1.bf16.xpose.msra.mxu0 (!%p3997_p3), %v3430_v54 }
 0x3b8   : > { %3456 = vmatprep.subr.bf16.mxu1 (!%p3997_p3), %v3433_v4  ;;  %3497 = vmatprep.subr.bf16.mxu0 (!%p3997_p3), %v3435_v51 }
 0x46c   : > { %v3298_v39 = vpop.f32.mrb[0].mxu0  ;;  %v3341_v40 = vpop.f32.mrb[0].mxu1  ;;  %3369 = sbr.rel (%p3997_p3) target bundleno = 1535 (0x5ff), region = 76 }
 0x46d   : > { %v3350_v47 = vadd.f32 %v3298_v39, %v2860_v22  ;;  %v3352_v27 = vadd.f32 %v3341_v40, %v2862_v37  ;;  %v3300_v14 = vpop.f32.mrb[1].mxu0  ;;  %v3343_v30 = vpop.f32.mrb[1].mxu1  ;;  %v3432_v22 = vld [vmem:[#allocation3 + $0x80] sm:$0xff] (!%p3997_p3)  ;;  %v3434_v37 = vld [vmem:[#allocation3 + $0x90] sm:$0xff] (!%p3997_p3) }
 0x46e   : > { %v3351_v59 = vadd.f32 %v3300_v14, %v2861_v13  ;;  %v3353_v25 = vadd.f32 %v3343_v30, %v2863_v55  ;;  %v3302_v3 = vpop.f32.mrb[2].mxu0  ;;  %v3345_v36 = vpop.f32.mrb[2].mxu1  ;;  %v3437_v13 = vld [vmem:[#allocation3 + $0xa8] sm:$0xff] (!%p3997_p3)  ;;  %v3439_v55 = vld [vmem:[#allocation3 + $0xb8] sm:$0xff] (!%p3997_p3)  ;;  %3457 = vmatpush1.bf16.xpose.msra.mxu1 (!%p3997_p3), %v3432_v22  ;;  %3498 = vmatpush1.bf16.xpose.msra.mxu0 (!%p3997_p3), %v3434_v37  ;;  %v3436_v39 = vld [vmem:[#allocation3 + $0xa0] sm:$0xff] (!%p3997_p3) }
 0x46f   : > { %3358 = vst [vmem:[#allocation2] sm:$0xff] %v3350_v47  ;;  %3360 = vst [vmem:[#allocation2 + $0x10] sm:$0xff] %v3352_v27  ;;  %v3354_v6 = vadd.f32 %v3302_v3, %v2864_v45  ;;  %v3356_v58 = vadd.f32 %v3345_v36, %v2866_v46  ;;  %v3304_v60 = vpop.f32.mrb[3].mxu0  ;;  %v3347_v7 = vpop.f32.mrb[3].mxu1  ;;  %3458 = vmatprep.subr.bf16.mxu1 (!%p3997_p3), %v3437_v13  ;;  %3499 = vmatprep.subr.bf16.mxu0 (!%p3997_p3), %v3439_v55  ;;  %v3438_v40 = vld [vmem:[#allocation3 + $0xb0] sm:$0xff] (!%p3997_p3)  ;;  %v3441_v45 = vld [vmem:[#allocation3 + $0xc8] sm:$0xff] (!%p3997_p3) }
 0x470   : > { %3359 = vst [vmem:[#allocation2 + $0x8] sm:$0xff] %v3351_v59  ;;  %3361 = vst [vmem:[#allocation2 + $0x18] sm:$0xff] %v3353_v25  ;;  %v3355_v15 = vadd.f32 %v3304_v60, %v2865_v31  ;;  %v3357_v18 = vadd.f32 %v3347_v7, %v2867_v1  ;;  %v3443_v46 = vld [vmem:[#allocation3 + $0xd8] sm:$0xff] (!%p3997_p3)  ;;  %v3440_v47 = vld [vmem:[#allocation3 + $0xc0] sm:$0xff] (!%p3997_p3) }
 0x471   : > { %3362 = vst [vmem:[#allocation2 + $0x20] sm:$0xff] %v3354_v6  ;;  %3364 = vst [vmem:[#allocation2 + $0x30] sm:$0xff] %v3356_v58  ;;  %v3442_v27 = vld [vmem:[#allocation3 + $0xd0] sm:$0xff] (!%p3997_p3)  ;;  %v3445_v14 = vld [vmem:[#allocation3 + $0xe8] sm:$0xff] (!%p3997_p3)  ;;  %v3401_v6 = vstv (!%p3997_p3), %s3400_s29 }
 0x472   : > { %3363 = vst [vmem:[#allocation2 + $0x28] sm:$0xff] %v3355_v15  ;;  %3365 = vst [vmem:[#allocation2 + $0x38] sm:$0xff] %v3357_v18  ;;  %v3447_v30 = vld [vmem:[#allocation3 + $0xf8] sm:$0xff] (!%p3997_p3)  ;;  %v3444_v31 = vld [vmem:[#allocation3 + $0xe0] sm:$0xff] (!%p3997_p3) }
 0x473   : > { %v3446_v1 = vld [vmem:[#allocation3 + $0xf0] sm:$0xff] }
 0x476   : > { %v5886_v23 = vld [vmem:[#allocation2] sm:$0xff]  ;;  %v5890_v50 = vld [vmem:[#allocation2 + $0x10] sm:$0xff]  ;;  %3459 = vmatpush1.bf16.xpose.msra.mxu1 %v3436_v39  ;;  %3500 = vmatpush1.bf16.xpose.msra.mxu0 %v3438_v40 }
 0x477   : > { %v5888_v24 = vld [vmem:[#allocation2 + $0x8] sm:$0xff]  ;;  %v5892_v5 = vld [vmem:[#allocation2 + $0x18] sm:$0xff]  ;;  %v3378_v62 = vmul.f32 %v5886_v23, %v5886_v23  ;;  %v3380_v12 = vmul.f32 %v5890_v50, %v5890_v50  ;;  %3460 = vmatprep.subr.bf16.mxu1 %v3441_v45  ;;  %3501 = vmatprep.subr.bf16.mxu0 %v3443_v46 }
 0x478   : > { %v3379_v11 = vmul.f32 %v5888_v24, %v5888_v24  ;;  %v5900_v16 = vld [vmem:[#allocation2 + $0x20] sm:$0xff]  ;;  %v5904_v17 = vld [vmem:[#allocation2 + $0x30] sm:$0xff]  ;;  %v3381_v43 = vmul.f32 %v5892_v5, %v5892_v5 }
 0x479   : > { %v5902_v42 = vld [vmem:[#allocation2 + $0x28] sm:$0xff]  ;;  %v5906_v61 = vld [vmem:[#allocation2 + $0x38] sm:$0xff]  ;;  %v3382_v21 = vmul.f32 %v5900_v16, %v5900_v16  ;;  %v3384_v56 = vmul.f32 %v5904_v17, %v5904_v17 }
 0x47a   : > { %v3383_v48 = vmul.f32 %v5902_v42, %v5902_v42  ;;  %v3386_v49 = vadd.f32 %v3379_v11, %v3378_v62  ;;  %v3385_v28 = vmul.f32 %v5906_v61, %v5906_v61 }
 0x47c   : > { %v3391_v44 = vadd.f32 %v3383_v48, %v3382_v21  ;;  %v3387_v0 = vadd.f32 %v3386_v49, %v3380_v12 }
 0x47e   : > { %v3392_v2 = vadd.f32 %v3391_v44, %v3384_v56  ;;  %v3388_v26 = vadd.f32 %v3387_v0, %v3381_v43  ;;  %3461 = vmatpush1.bf16.xpose.msra.mxu1 %v3440_v47  ;;  %3502 = vmatpush1.bf16.xpose.msra.mxu0 %v3442_v27 }
 0x47f   : > { %3462 = vmatprep.subr.bf16.mxu1 %v3445_v14  ;;  %3503 = vmatprep.subr.bf16.mxu0 %v3447_v30 }
 0x480   : > { %3389 = vadd.xlane.f32.xlu0 %v3388_v26  ;;  %v3393_v53 = vadd.f32 %v3392_v2, %v3385_v28 }
 0x484   : > { %3394 = vadd.xlane.f32.xlu0 %v3393_v53 }
 0x486   : > { %3463 = vmatpush1.bf16.xpose.msra.mxu1 %v3444_v31  ;;  %3504 = vmatpush1.bf16.xpose.msra.mxu0 %v3446_v1 }
 0x50d   : > { %v3390_v59 = vpop.xlane.xlu0 %3389 }
 0x50e   : > { %v3396_v25 = vmax.f32 %v3390_v59, 1e-24 }
 0x510   : > { %4807 = vrsqrt.f32 %v3396_v25 }
 0x511   : > { %v3395_v3 = vpop.xlane.xlu0 %3394 }
 0x512   : > { %v3397_v36 = vmax.f32 %v3395_v3, 1e-24 }
 0x514   : > { %4809 = vrsqrt.f32 %v3397_v36 }
 0x51a   : > { %v4808_v58 = vpop.eup %4807 }
 0x51b   : > { %v3402_v60 = vmul.f32 %v4808_v58, %v3401_v6 }
 0x51d   : > { %v3405_v18 = vmul.f32 %v3402_v60, %v5888_v24  ;;  %v3407_v62 = vmul.f32 %v3402_v60, %v5892_v5  ;;  %v3404_v11 = vmul.f32 %v3402_v60, %v5886_v23  ;;  %v3406_v12 = vmul.f32 %v3402_v60, %v5890_v50 }
 0x51e   : > { %v4810_v7 = vpop.eup %4809 }
 0x51f   : > { %v3403_v15 = vmul.f32 %v4810_v7, %v3401_v6 }
 0x521   : > { %v3409_v21 = vmul.f32 %v3403_v15, %v5902_v42  ;;  %v3411_v48 = vmul.f32 %v3403_v15, %v5906_v61  ;;  %v3408_v63 = vmul.f32 %v3403_v15, %v5900_v16  ;;  %v3410_v43 = vmul.f32 %v3403_v15, %v5904_v17 }
 0x523   : > { %v3413_v49 = vpack.c.bf16 %v3409_v21, %v3405_v18  ;;  %v3415_v56 = vpack.c.bf16 %v3411_v48, %v3407_v62  ;;  %v3412_v57 = vpack.c.bf16 %v3408_v63, %v3404_v11  ;;  %v3414_v9 = vpack.c.bf16 %v3410_v43, %v3406_v12 }
 0x525   : > { %3480 = vmatprep.mubr.bf16.mxu1 %v3413_v49  ;;  %3521 = vmatprep.mubr.bf16.mxu0 %v3415_v56 }
 0x526   : > { %3481 = vmatmul.mubr.bf16.vlgmr.msra.gmra.mrb[0].mxu1 %v3412_v57  ;;  %3522 = vmatmul.mubr.bf16.vlgmr.msra.gmra.mrb[0].mxu0 %v3414_v9 }
 0x5f9   : > { %v3482_v24 = vpop.f32.mrb[0].mxu1  ;;  %v3523_v23 = vpop.f32.mrb[0].mxu0 }
 0x5fa   : > { %v3524_v5 = vadd.f32 %v3523_v23, %v3482_v24  ;;  %v3484_v50 = vpop.f32.mrb[1].mxu1  ;;  %v3525_v10 = vpop.f32.mrb[1].mxu0 }
 0x5fb   : > { %v3485_v42 = vpop.f32.mrb[2].mxu1  ;;  %v3526_v44 = vpop.f32.mrb[2].mxu0 }
 0x5fc   : > { %3530 = vst [vmem:[#allocation17] sm:$0xff] %v3524_v5  ;;  %v3527_v61 = vadd.f32 %v3526_v44, %v3485_v42  ;;  %v3487_v16 = vpop.f32.mrb[3].mxu1  ;;  %v3528_v20 = vpop.f32.mrb[3].mxu0 }
 0x5fe   : > { %3531 = vst [vmem:[#allocation17 + $0x8] sm:$0xff] %v3527_v61 }
 0x5ff PF: > { %p4252_p0 = scmp.eq.s32.totalorder %s5169_s0, 7  ;;  %s5094_s9 = smov [#allocation17]  }
 0x600   : > { %s3541_s10 = sshll.u32 %s5094_s9, 4  ;;  %s3542_s10 = int_to_ptr.vmem [resolvable:$true] %s3541_s10 }
 0x601   : > { %s4983_s14 = scalar_lea.vmem %s3542_s10, 256  ;;  %p4990_p12 = scmp.lt.s32.totalorder %s3542_s10, %s3542_s10 }
 0x602   : > { %p4984_p6 = scmp.ne.s32.totalorder %s3542_s10, %s4983_s14  ;;  %p4991_p9 = scmp.lt.s32.totalorder %s4983_s14, %s4983_s14 }
 0x604   : > { %p4985_p8 = pnand %p4984_p6, %p4252_p0  ;;  %p4992_p7 = por %p4991_p9, %p4990_p12 }
 0x606   : > { %p4986_p10 = pneg %p4985_p8 }
 0x608   : > { %p4993_p1 = pnand %p4992_p7, %p4986_p10 }
 0x60a   : > { %4996 = shalt.err (!%p4993_p1)
}
 0x60b   : > { %s4997_s17 = scalar_lea.hbm %s5974_s7, 256 }
 0x60c   : > { %p4998_p4 = scmp.ne.s32.totalorder %s5974_s7, %s4997_s17  ;;  %p5003_p13 = scmp.lt.u32.totalorder %s4997_s17, %s5974_s7 }
 0x60e   : > { %p4999_p5 = pnand %p4998_p4, %p4252_p0 }
 0x610   : > { %p5000_p11 = pneg %p4999_p5 }
 0x612   : > { %p5005_p2 = pnand %p5003_p13, %p5000_p11 }
 0x614   : > { %5008 = shalt.err (!%p5005_p2)
}
 0x615   : > { %s5095_s5 = smov 128   ;;  %s5096_s18 = smov 8  }
 0x616   : > { %4220 = dma.vmem_to_hbm [thread:$0]  (%p4252_p0), %s3542_s10, 256, %s5974_s7, [#allocation8], %s5095_s5, %s5095_s5, %s5096_s18  }
 0x617   : > { %5054 = dma.done.wait (%p4252_p0), [#allocation8], 256  }
 0x618   : > { %5056 = vsyncadd (%p4252_p0), [#allocation8], 4294967040 }
 0x619 PF: > { %s27_s8 = sadd.s32 1, %s5079_s8   ;;  %s6060_s26 = smov %s5063_s27 }
 0x61a   : > { %p24_p3 = scmp.ge.s32.totalorder %s27_s8, 10   ;;  %s6061_s27 = smov %s5067_s28 }
 0x61b   : > { %s6062_s28 = smov %s5300_s16  ;;  %s6063_s29 = smov %s5075_s30 }
 0x61c   : > { %s6064_s30 = smov %s6066_s23  ;;  %26 = sbr.rel (!%p24_p3) target bundleno = 15 (0xf), region = 119 }
 0x623   :  { %3557 = vsyncpa [#allocation7], 1 }
 0x624   :  { %3559 = vsyncpa [#allocation7 + $0x1], 1 }
 0x625   :  { %3560 = vsyncpa [#allocation10], 1 }
 0x626   :  { %3562 = vsyncpa [#allocation10 + $0x1], 1 }
 0x627   :  { %3563 = vsyncpa [#allocation13], 1 }
 0x628   :  { %3564 = vsyncpa [#allocation16], 1 }
 0x629   :  { %3565 = vsyncpa [#allocation8], 1 }
 0x62a   :  { %3567 = vsyncpa [#allocation8 + $0x1], 1 }

</bundles_post_ra>
